<compile_context>
chip_gen: v5e
topology: v5e:2x2
jax: 0.10.0
libtpu: 0.0.40
codegen_flags: <defaults>
</compile_context>

<pallas_src>
import functools

import numpy as np
import jax
import jax.numpy as jnp
from jax import lax
from jax.experimental import pallas as pl
from jax.experimental.pallas import tpu as pltpu


def _lstm_kernel(x_ref, wih_ref, whh_ref, b_ref, out_ref, gx_buf,
                 *, seq, bpad, hidden, num_layers):
    """Single-invocation 3-layer LSTM.

    x_ref   : (seq*bpad, Dmax) f32   padded, flattened input sequence
    wih_ref : (L, Dmax, 4H)    bf16  input->gates weights (pre-transposed,
                                     zero-padded rows past each layer's D_in)
    whh_ref : (L, H, 4H)       f32   recurrent weights (pre-transposed)
    b_ref   : (L, 1, 4H)       f32   combined bias b_ih + b_hh
    out_ref : (seq*bpad, Dmax) f32   layer hand-off buffer == kernel output
    gx_buf  : (seq*bpad, 4H)   f32   per-layer input->gates projection
    """
    H = hidden
    Dmax = out_ref.shape[-1]

    def activations(gates):
        # Whole-tile EUP passes, then static lane slices.
        # PyTorch gate order: i, f, g, o.
        sig = jax.nn.sigmoid(gates)
        th = jnp.tanh(gates)
        return (sig[:, 0:H], sig[:, H:2 * H],
                th[:, 2 * H:3 * H], sig[:, 3 * H:4 * H])

    for l in range(num_layers):
        wih = wih_ref[l]            # (Dmax, 4H) bf16
        whh = whh_ref[l]            # (H, 4H)    f32 (recurrence stays f32)
        b = b_ref[l]                # (1, 4H)    f32

        # Input->gates projection for every timestep in one bf16 MXU matmul,
        # bias folded in.  Layer 0 reads the input slab; layers >=1 read the
        # previous layer's hidden states straight out of the output block.
        layer_in = x_ref[...] if l == 0 else out_ref[...]
        gx_buf[...] = jnp.dot(layer_in.astype(jnp.bfloat16), wih,
                              preferred_element_type=jnp.float32) + b

        if H == Dmax:
            def store_h(row, h_new):
                out_ref[pl.ds(row, bpad), :] = h_new
        else:
            def store_h(row, h_new):
                out_ref[pl.ds(row, bpad), 0:H] = h_new

        # Peeled t = 0: h0 = c0 = 0 -> no recurrent matmul, no f*c term.
        i0, _f0, g0, o0 = activations(gx_buf[pl.ds(0, bpad), :])
        c = i0 * g0
        h = o0 * jnp.tanh(c)
        store_h(0, h)

        def step(t, carry):
            h, c = carry
            row = pl.multiple_of(t * bpad, bpad)
            # Tiny (bpad, H) @ (H, 4H) recurrent matmul, kept in f32 per the
            # precision review; the big projection above is the bf16 one.
            gates = gx_buf[pl.ds(row, bpad), :] + jnp.dot(
                h, whh, preferred_element_type=jnp.float32)
            i, f, g, o = activations(gates)
            c_new = f * c + i * g
            h_new = o * jnp.tanh(c_new)
            store_h(row, h_new)
            return (h_new, c_new)

        # seq is small and static: fully unroll so the scheduler can overlap
        # the gx load, the small recurrent matmul and the EUP pushes of
        # adjacent timesteps.
        lax.fori_loop(1, seq, step, (h, c), unroll=True)

        if l == 0 and Dmax > H:
            # Zero padding lanes of the hand-off buffer once so later layers'
            # projections never read uninitialized VMEM (the padded W_ih rows
            # are zero too; this guards against NaN * 0).
            out_ref[:, H:Dmax] = jnp.zeros(
                (out_ref.shape[0], Dmax - H), jnp.float32)


def pack_lstm_params(params, hidden_size):
    """One-time host-side packing of PyTorch-layout LSTM params.

    params: list of (w_ih, w_hh, b_ih, b_hh) per layer (nn.LSTM layout).
    Returns (wih_all bf16 (L,Dmax,4H), whh_all f32 (L,H,4H), b_all f32 (L,1,4H)).
    """
    H = hidden_size
    L = len(params)
    input_size = np.asarray(params[0][0]).shape[1]
    Dmax = max(input_size, H)

    wih_all = np.zeros((L, Dmax, 4 * H), np.float32)
    whh_all = np.zeros((L, H, 4 * H), np.float32)
    b_all = np.zeros((L, 1, 4 * H), np.float32)
    for l, (w_ih, w_hh, b_ih, b_hh) in enumerate(params):
        w_ih = np.asarray(w_ih, np.float32)
        w_hh = np.asarray(w_hh, np.float32)
        din = w_ih.shape[1]
        wih_all[l, :din, :] = w_ih.T
        whh_all[l] = w_hh.T
        b_all[l, 0] = np.asarray(b_ih, np.float32) + np.asarray(b_hh, np.float32)

    return (jnp.asarray(wih_all, jnp.bfloat16),
            jnp.asarray(whh_all, jnp.float32),
            jnp.asarray(b_all, jnp.float32))


@functools.partial(jax.jit, static_argnames=("hidden_size",))
def ann_extension_forward(x, wih_all, whh_all, b_all, hidden_size):
    """Forward of Ann_extension: output[0].reshape(-1) of a 3-layer LSTM.

    x: (seq, batch, input_size).  Weights must come from pack_lstm_params
    (done once, outside the per-call path).  Returns (seq*batch*H,) f32.
    """
    seq, batch, input_size = x.shape
    H = hidden_size
    L = wih_all.shape[0]
    Dmax = wih_all.shape[1]
    B_pad = -(-batch // 8) * 8           # pad batch to a sublane-tile multiple

    # Time-major, batch padded, flattened to 2-D so every per-timestep access
    # inside the kernel is an aligned full-sublane-tile row slice.
    x_pad = jnp.zeros((seq, B_pad, Dmax), jnp.float32)
    x_pad = x_pad.at[:, :batch, :input_size].set(x.astype(jnp.float32))
    x_flat = x_pad.reshape(seq * B_pad, Dmax)

    kernel = functools.partial(_lstm_kernel, seq=seq, bpad=B_pad,
                               hidden=H, num_layers=L)

    out = pl.pallas_call(
        kernel,
        out_shape=jax.ShapeDtypeStruct((seq * B_pad, Dmax), jnp.float32),
        grid_spec=pltpu.PrefetchScalarGridSpec(
            num_scalar_prefetch=0,
            grid=(1,),                                   # single invocation
            in_specs=[
                pl.BlockSpec((seq * B_pad, Dmax), lambda i: (0, 0)),   # x
                pl.BlockSpec((L, Dmax, 4 * H), lambda i: (0, 0, 0)),   # W_ih
                pl.BlockSpec((L, H, 4 * H), lambda i: (0, 0, 0)),      # W_hh
                pl.BlockSpec((L, 1, 4 * H), lambda i: (0, 0, 0)),      # bias
            ],
            # Output block doubles as the resident layer hand-off buffer.
            out_specs=pl.BlockSpec((seq * B_pad, Dmax), lambda i: (0, 0)),
            scratch_shapes=[
                pltpu.VMEM((seq * B_pad, 4 * H), jnp.float32),  # x-gates (+bias)
            ],
        ),
        compiler_params=pltpu.CompilerParams(
            dimension_semantics=("arbitrary",)),
    )(x_flat, wih_all, whh_all, b_all)

    # Undo batch/lane padding, restore (seq, batch, H), flatten like
    # output[0].reshape(-1).
    return out.reshape(seq, B_pad, Dmax)[:, :batch, :H].reshape(-1)


def _init_lstm_params(key, input_size, hidden_size, num_layers):
    """Deterministic PyTorch-style init: U(-1/sqrt(H), 1/sqrt(H))."""
    k = 1.0 / np.sqrt(hidden_size)
    params = []
    for l in range(num_layers):
        din = input_size if l == 0 else hidden_size
        key, k1, k2, k3, k4 = jax.random.split(key, 5)
        w_ih = jax.random.uniform(k1, (4 * hidden_size, din), jnp.float32, -k, k)
        w_hh = jax.random.uniform(k2, (4 * hidden_size, hidden_size), jnp.float32, -k, k)
        b_ih = jax.random.uniform(k3, (4 * hidden_size,), jnp.float32, -k, k)
        b_hh = jax.random.uniform(k4, (4 * hidden_size,), jnp.float32, -k, k)
        params.append((w_ih, w_hh, b_ih, b_hh))
    return params


def _reference_forward(x, params, hidden_size):
    """Pure-JAX f32 reference LSTM (PyTorch semantics, zero initial states)."""
    seq, batch, _ = x.shape
    H = hidden_size
    layer_in = x.astype(jnp.float32)
    for (w_ih, w_hh, b_ih, b_hh) in params:
        h = jnp.zeros((batch, H), jnp.float32)
        c = jnp.zeros((batch, H), jnp.float32)
        outs = []
        for t in range(seq):
            gates = layer_in[t] @ w_ih.T + b_ih + h @ w_hh.T + b_hh
            i = jax.nn.sigmoid(gates[:, 0:H])
            f = jax.nn.sigmoid(gates[:, H:2 * H])
            g = jnp.tanh(gates[:, 2 * H:3 * H])
            o = jax.nn.sigmoid(gates[:, 3 * H:4 * H])
            c = f * c + i * g
            h = o * jnp.tanh(c)
            outs.append(h)
        layer_in = jnp.stack(outs, axis=0)
    return layer_in.reshape(-1)


if __name__ == "__main__":
    seq_len, batch, input_size, output_size = 8, 2, 16, 32
    num_layers = 3

    key = jax.random.PRNGKey(0)
    key, kx, kp = jax.random.split(key, 3)
    x = jax.random.normal(kx, (seq_len, batch, input_size), jnp.float32)
    params = _init_lstm_params(kp, input_size, output_size, num_layers)

    # One-time weight packing (hoisted out of the per-call path).
    wih_all, whh_all, b_all = pack_lstm_params(params, output_size)

    out = ann_extension_forward(x, wih_all, whh_all, b_all,
                                hidden_size=output_size)
    out = jax.block_until_ready(out)

    ref = _reference_forward(x, params, output_size)
    # The big per-layer input projection runs in bf16 on the MXU (f32 acc);
    # the recurrence and gate math are f32, so the tolerance is tighter than
    # the previous all-bf16 version.
    np.testing.assert_allclose(np.asarray(out), np.asarray(ref),
                               rtol=2e-2, atol=2e-2)
    assert out.shape == (seq_len * batch * output_size,)

    print("KERNEL_OK")
</pallas_src>

<mosaic_0001>
module attributes {stable_mosaic.version = 11 : i64} {
  func.func @_lstm_kernel(%arg0: i32, %arg1: memref<64x32xf32, #tpu.memory_space<vmem>>, %arg2: memref<3x32x128xbf16, #tpu.memory_space<vmem>>, %arg3: memref<3x32x128xf32, #tpu.memory_space<vmem>>, %arg4: memref<3x1x128xf32, #tpu.memory_space<vmem>>, %arg5: memref<64x32xf32, #tpu.memory_space<vmem>>, %arg6: memref<64x128xf32, #tpu.memory_space<vmem>>) attributes {dimension_semantics = [#tpu.dimension_semantics<arbitrary>], iteration_bounds = array<i64: 1>, scalar_prefetch = 0 : i64, scratch_operands = 1 : i64, tpu.core_type = #tpu.core_type<tc>, window_params = [{pipeline_mode = #tpu.pipeline_mode<synchronous>, transform_indices = @transform_0, window_bounds = array<i64: 64, 32>}, {pipeline_mode = #tpu.pipeline_mode<synchronous>, transform_indices = @transform_1, window_bounds = array<i64: 3, 32, 128>}, {pipeline_mode = #tpu.pipeline_mode<synchronous>, transform_indices = @transform_2, window_bounds = array<i64: 3, 32, 128>}, {pipeline_mode = #tpu.pipeline_mode<synchronous>, transform_indices = @transform_3, window_bounds = array<i64: 3, 1, 128>}, {pipeline_mode = #tpu.pipeline_mode<synchronous>, transform_indices = @transform_4, window_bounds = array<i64: 64, 32>}]} {
    %c0 = arith.constant 0 : index
    %c0_0 = arith.constant 0 : index
    %c0_1 = arith.constant 0 : index
    %0 = vector.load %arg2[%c0, %c0_0, %c0_1] : memref<3x32x128xbf16, #tpu.memory_space<vmem>>, vector<1x32x128xbf16>
    %1 = vector.shape_cast %0 : vector<1x32x128xbf16> to vector<32x128xbf16>
    %c0_2 = arith.constant 0 : index
    %c0_3 = arith.constant 0 : index
    %c0_4 = arith.constant 0 : index
    %2 = vector.load %arg3[%c0_2, %c0_3, %c0_4] : memref<3x32x128xf32, #tpu.memory_space<vmem>>, vector<1x32x128xf32>
    %3 = vector.shape_cast %2 : vector<1x32x128xf32> to vector<32x128xf32>
    %c0_5 = arith.constant 0 : index
    %c0_6 = arith.constant 0 : index
    %c0_7 = arith.constant 0 : index
    %4 = vector.load %arg4[%c0_5, %c0_6, %c0_7] : memref<3x1x128xf32, #tpu.memory_space<vmem>>, vector<1x1x128xf32>
    %5 = vector.shape_cast %4 : vector<1x1x128xf32> to vector<1x128xf32>
    %c0_8 = arith.constant 0 : index
    %c0_9 = arith.constant 0 : index
    %6 = vector.load %arg1[%c0_8, %c0_9] : memref<64x32xf32, #tpu.memory_space<vmem>>, vector<64x32xf32>
    %7 = arith.truncf %6 : vector<64x32xf32> to vector<64x32xbf16>
    %cst = arith.constant dense<0.000000e+00> : vector<64x128xf32>
    %8 = tpu.matmul %7, %1, %cst {dimension_numbers = #tpu.dot_dimension_numbers<[1], [0], [0], [1], [0, 0, 1, 1], [], []>} : vector<64x32xbf16>, vector<32x128xbf16>, vector<64x128xf32> -> vector<64x128xf32>
    %9 = vector.broadcast %5 : vector<1x128xf32> to vector<64x128xf32>
    %10 = arith.addf %8, %9 : vector<64x128xf32>
    %c0_10 = arith.constant 0 : index
    %c0_11 = arith.constant 0 : index
    %11 = vector.load %arg6[%c0_10, %c0_11] : memref<64x128xf32, #tpu.memory_space<vmem>>, vector<64x128xf32>
    tpu.vector_store %arg6[%c0_10, %c0_11], %10 {strides = array<i32>} : memref<64x128xf32, #tpu.memory_space<vmem>>, vector<64x128xf32>,
    %c0_12 = arith.constant 0 : index
    %c0_13 = arith.constant 0 : index
    %12 = vector.load %arg6[%c0_12, %c0_13] : memref<64x128xf32, #tpu.memory_space<vmem>>, vector<8x128xf32>
    %13 = arith.negf %12 : vector<8x128xf32>
    %14 = math.exp %13 : vector<8x128xf32>
    %cst_14 = arith.constant 1.000000e+00 : f32
    %15 = vector.broadcast %cst_14 : f32 to vector<8x128xf32>
    %16 = arith.addf %15, %14 : vector<8x128xf32>
    %17 = arith.divf %15, %16 : vector<8x128xf32>
    %18 = math.tanh %12 : vector<8x128xf32>
    %19 = vector.extract_strided_slice %17 {offsets = [0, 0], sizes = [8, 32], strides = [1, 1]} : vector<8x128xf32> to vector<8x32xf32>
    %20 = vector.extract_strided_slice %18 {offsets = [0, 64], sizes = [8, 32], strides = [1, 1]} : vector<8x128xf32> to vector<8x32xf32>
    %21 = vector.extract_strided_slice %17 {offsets = [0, 96], sizes = [8, 32], strides = [1, 1]} : vector<8x128xf32> to vector<8x32xf32>
    %22 = arith.mulf %19, %20 : vector<8x32xf32>
    %23 = math.tanh %22 : vector<8x32xf32>
    %24 = arith.mulf %21, %23 : vector<8x32xf32>
    %c0_15 = arith.constant 0 : index
    %c0_16 = arith.constant 0 : index
    %25 = vector.load %arg5[%c0_15, %c0_16] : memref<64x32xf32, #tpu.memory_space<vmem>>, vector<8x32xf32>
    tpu.vector_store %arg5[%c0_15, %c0_16], %24 {strides = array<i32>} : memref<64x32xf32, #tpu.memory_space<vmem>>, vector<8x32xf32>,
    %c1_i32 = arith.constant 1 : i32
    %c8_i32 = arith.constant 8 : i32
    %26 = arith.muli %c1_i32, %c8_i32 : i32
    %27 = tpu.assume_multiple %26, 8 : i32
    %28 = arith.index_cast %27 : i32 to index
    %c0_17 = arith.constant 0 : index
    %29 = vector.load %arg6[%28, %c0_17] : memref<64x128xf32, #tpu.memory_space<vmem>>, vector<8x128xf32>
    %cst_18 = arith.constant dense<0.000000e+00> : vector<8x128xf32>
    %30 = tpu.matmul %24, %3, %cst_18 {dimension_numbers = #tpu.dot_dimension_numbers<[1], [0], [0], [1], [0, 0, 1, 1], [], []>} : vector<8x32xf32>, vector<32x128xf32>, vector<8x128xf32> -> vector<8x128xf32>
    %31 = arith.addf %29, %30 : vector<8x128xf32>
    %32 = arith.negf %31 : vector<8x128xf32>
    %33 = math.exp %32 : vector<8x128xf32>
    %cst_19 = arith.constant 1.000000e+00 : f32
    %34 = vector.broadcast %cst_19 : f32 to vector<8x128xf32>
    %35 = arith.addf %34, %33 : vector<8x128xf32>
    %36 = arith.divf %34, %35 : vector<8x128xf32>
    %37 = math.tanh %31 : vector<8x128xf32>
    %38 = vector.extract_strided_slice %36 {offsets = [0, 0], sizes = [8, 32], strides = [1, 1]} : vector<8x128xf32> to vector<8x32xf32>
    %39 = vector.extract_strided_slice %36 {offsets = [0, 32], sizes = [8, 32], strides = [1, 1]} : vector<8x128xf32> to vector<8x32xf32>
    %40 = vector.extract_strided_slice %37 {offsets = [0, 64], sizes = [8, 32], strides = [1, 1]} : vector<8x128xf32> to vector<8x32xf32>
    %41 = vector.extract_strided_slice %36 {offsets = [0, 96], sizes = [8, 32], strides = [1, 1]} : vector<8x128xf32> to vector<8x32xf32>
    %42 = arith.mulf %39, %22 : vector<8x32xf32>
    %43 = arith.mulf %38, %40 : vector<8x32xf32>
    %44 = arith.addf %42, %43 : vector<8x32xf32>
    %45 = math.tanh %44 : vector<8x32xf32>
    %46 = arith.mulf %41, %45 : vector<8x32xf32>
    %47 = arith.index_cast %27 : i32 to index
    %c0_20 = arith.constant 0 : index
    %48 = vector.load %arg5[%47, %c0_20] : memref<64x32xf32, #tpu.memory_space<vmem>>, vector<8x32xf32>
    tpu.vector_store %arg5[%47, %c0_20], %46 {strides = array<i32>} : memref<64x32xf32, #tpu.memory_space<vmem>>, vector<8x32xf32>,
    %c2_i32 = arith.constant 2 : i32
    %c8_i32_21 = arith.constant 8 : i32
    %49 = arith.muli %c2_i32, %c8_i32_21 : i32
    %50 = tpu.assume_multiple %49, 8 : i32
    %51 = arith.index_cast %50 : i32 to index
    %c0_22 = arith.constant 0 : index
    %52 = vector.load %arg6[%51, %c0_22] : memref<64x128xf32, #tpu.memory_space<vmem>>, vector<8x128xf32>
    %cst_23 = arith.constant dense<0.000000e+00> : vector<8x128xf32>
    %53 = tpu.matmul %46, %3, %cst_23 {dimension_numbers = #tpu.dot_dimension_numbers<[1], [0], [0], [1], [0, 0, 1, 1], [], []>} : vector<8x32xf32>, vector<32x128xf32>, vector<8x128xf32> -> vector<8x128xf32>
    %54 = arith.addf %52, %53 : vector<8x128xf32>
    %55 = arith.negf %54 : vector<8x128xf32>
    %56 = math.exp %55 : vector<8x128xf32>
    %cst_24 = arith.constant 1.000000e+00 : f32
    %57 = vector.broadcast %cst_24 : f32 to vector<8x128xf32>
    %58 = arith.addf %57, %56 : vector<8x128xf32>
    %59 = arith.divf %57, %58 : vector<8x128xf32>
    %60 = math.tanh %54 : vector<8x128xf32>
    %61 = vector.extract_strided_slice %59 {offsets = [0, 0], sizes = [8, 32], strides = [1, 1]} : vector<8x128xf32> to vector<8x32xf32>
    %62 = vector.extract_strided_slice %59 {offsets = [0, 32], sizes = [8, 32], strides = [1, 1]} : vector<8x128xf32> to vector<8x32xf32>
    %63 = vector.extract_strided_slice %60 {offsets = [0, 64], sizes = [8, 32], strides = [1, 1]} : vector<8x128xf32> to vector<8x32xf32>
    %64 = vector.extract_strided_slice %59 {offsets = [0, 96], sizes = [8, 32], strides = [1, 1]} : vector<8x128xf32> to vector<8x32xf32>
    %65 = arith.mulf %62, %44 : vector<8x32xf32>
    %66 = arith.mulf %61, %63 : vector<8x32xf32>
    %67 = arith.addf %65, %66 : vector<8x32xf32>
    %68 = math.tanh %67 : vector<8x32xf32>
    %69 = arith.mulf %64, %68 : vector<8x32xf32>
    %70 = arith.index_cast %50 : i32 to index
    %c0_25 = arith.constant 0 : index
    %71 = vector.load %arg5[%70, %c0_25] : memref<64x32xf32, #tpu.memory_space<vmem>>, vector<8x32xf32>
    tpu.vector_store %arg5[%70, %c0_25], %69 {strides = array<i32>} : memref<64x32xf32, #tpu.memory_space<vmem>>, vector<8x32xf32>,
    %c3_i32 = arith.constant 3 : i32
    %c8_i32_26 = arith.constant 8 : i32
    %72 = arith.muli %c3_i32, %c8_i32_26 : i32
    %73 = tpu.assume_multiple %72, 8 : i32
    %74 = arith.index_cast %73 : i32 to index
    %c0_27 = arith.constant 0 : index
    %75 = vector.load %arg6[%74, %c0_27] : memref<64x128xf32, #tpu.memory_space<vmem>>, vector<8x128xf32>
    %cst_28 = arith.constant dense<0.000000e+00> : vector<8x128xf32>
    %76 = tpu.matmul %69, %3, %cst_28 {dimension_numbers = #tpu.dot_dimension_numbers<[1], [0], [0], [1], [0, 0, 1, 1], [], []>} : vector<8x32xf32>, vector<32x128xf32>, vector<8x128xf32> -> vector<8x128xf32>
    %77 = arith.addf %75, %76 : vector<8x128xf32>
    %78 = arith.negf %77 : vector<8x128xf32>
    %79 = math.exp %78 : vector<8x128xf32>
    %cst_29 = arith.constant 1.000000e+00 : f32
    %80 = vector.broadcast %cst_29 : f32 to vector<8x128xf32>
    %81 = arith.addf %80, %79 : vector<8x128xf32>
    %82 = arith.divf %80, %81 : vector<8x128xf32>
    %83 = math.tanh %77 : vector<8x128xf32>
    %84 = vector.extract_strided_slice %82 {offsets = [0, 0], sizes = [8, 32], strides = [1, 1]} : vector<8x128xf32> to vector<8x32xf32>
    %85 = vector.extract_strided_slice %82 {offsets = [0, 32], sizes = [8, 32], strides = [1, 1]} : vector<8x128xf32> to vector<8x32xf32>
    %86 = vector.extract_strided_slice %83 {offsets = [0, 64], sizes = [8, 32], strides = [1, 1]} : vector<8x128xf32> to vector<8x32xf32>
    %87 = vector.extract_strided_slice %82 {offsets = [0, 96], sizes = [8, 32], strides = [1, 1]} : vector<8x128xf32> to vector<8x32xf32>
    %88 = arith.mulf %85, %67 : vector<8x32xf32>
    %89 = arith.mulf %84, %86 : vector<8x32xf32>
    %90 = arith.addf %88, %89 : vector<8x32xf32>
    %91 = math.tanh %90 : vector<8x32xf32>
    %92 = arith.mulf %87, %91 : vector<8x32xf32>
    %93 = arith.index_cast %73 : i32 to index
    %c0_30 = arith.constant 0 : index
    %94 = vector.load %arg5[%93, %c0_30] : memref<64x32xf32, #tpu.memory_space<vmem>>, vector<8x32xf32>
    tpu.vector_store %arg5[%93, %c0_30], %92 {strides = array<i32>} : memref<64x32xf32, #tpu.memory_space<vmem>>, vector<8x32xf32>,
    %c4_i32 = arith.constant 4 : i32
    %c8_i32_31 = arith.constant 8 : i32
    %95 = arith.muli %c4_i32, %c8_i32_31 : i32
    %96 = tpu.assume_multiple %95, 8 : i32
    %97 = arith.index_cast %96 : i32 to index
    %c0_32 = arith.constant 0 : index
    %98 = vector.load %arg6[%97, %c0_32] : memref<64x128xf32, #tpu.memory_space<vmem>>, vector<8x128xf32>
    %cst_33 = arith.constant dense<0.000000e+00> : vector<8x128xf32>
    %99 = tpu.matmul %92, %3, %cst_33 {dimension_numbers = #tpu.dot_dimension_numbers<[1], [0], [0], [1], [0, 0, 1, 1], [], []>} : vector<8x32xf32>, vector<32x128xf32>, vector<8x128xf32> -> vector<8x128xf32>
    %100 = arith.addf %98, %99 : vector<8x128xf32>
    %101 = arith.negf %100 : vector<8x128xf32>
    %102 = math.exp %101 : vector<8x128xf32>
    %cst_34 = arith.constant 1.000000e+00 : f32
    %103 = vector.broadcast %cst_34 : f32 to vector<8x128xf32>
    %104 = arith.addf %103, %102 : vector<8x128xf32>
    %105 = arith.divf %103, %104 : vector<8x128xf32>
    %106 = math.tanh %100 : vector<8x128xf32>
    %107 = vector.extract_strided_slice %105 {offsets = [0, 0], sizes = [8, 32], strides = [1, 1]} : vector<8x128xf32> to vector<8x32xf32>
    %108 = vector.extract_strided_slice %105 {offsets = [0, 32], sizes = [8, 32], strides = [1, 1]} : vector<8x128xf32> to vector<8x32xf32>
    %109 = vector.extract_strided_slice %106 {offsets = [0, 64], sizes = [8, 32], strides = [1, 1]} : vector<8x128xf32> to vector<8x32xf32>
    %110 = vector.extract_strided_slice %105 {offsets = [0, 96], sizes = [8, 32], strides = [1, 1]} : vector<8x128xf32> to vector<8x32xf32>
    %111 = arith.mulf %108, %90 : vector<8x32xf32>
    %112 = arith.mulf %107, %109 : vector<8x32xf32>
    %113 = arith.addf %111, %112 : vector<8x32xf32>
    %114 = math.tanh %113 : vector<8x32xf32>
    %115 = arith.mulf %110, %114 : vector<8x32xf32>
    %116 = arith.index_cast %96 : i32 to index
    %c0_35 = arith.constant 0 : index
    %117 = vector.load %arg5[%116, %c0_35] : memref<64x32xf32, #tpu.memory_space<vmem>>, vector<8x32xf32>
    tpu.vector_store %arg5[%116, %c0_35], %115 {strides = array<i32>} : memref<64x32xf32, #tpu.memory_space<vmem>>, vector<8x32xf32>,
    %c5_i32 = arith.constant 5 : i32
    %c8_i32_36 = arith.constant 8 : i32
    %118 = arith.muli %c5_i32, %c8_i32_36 : i32
    %119 = tpu.assume_multiple %118, 8 : i32
    %120 = arith.index_cast %119 : i32 to index
    %c0_37 = arith.constant 0 : index
    %121 = vector.load %arg6[%120, %c0_37] : memref<64x128xf32, #tpu.memory_space<vmem>>, vector<8x128xf32>
    %cst_38 = arith.constant dense<0.000000e+00> : vector<8x128xf32>
    %122 = tpu.matmul %115, %3, %cst_38 {dimension_numbers = #tpu.dot_dimension_numbers<[1], [0], [0], [1], [0, 0, 1, 1], [], []>} : vector<8x32xf32>, vector<32x128xf32>, vector<8x128xf32> -> vector<8x128xf32>
    %123 = arith.addf %121, %122 : vector<8x128xf32>
    %124 = arith.negf %123 : vector<8x128xf32>
    %125 = math.exp %124 : vector<8x128xf32>
    %cst_39 = arith.constant 1.000000e+00 : f32
    %126 = vector.broadcast %cst_39 : f32 to vector<8x128xf32>
    %127 = arith.addf %126, %125 : vector<8x128xf32>
    %128 = arith.divf %126, %127 : vector<8x128xf32>
    %129 = math.tanh %123 : vector<8x128xf32>
    %130 = vector.extract_strided_slice %128 {offsets = [0, 0], sizes = [8, 32], strides = [1, 1]} : vector<8x128xf32> to vector<8x32xf32>
    %131 = vector.extract_strided_slice %128 {offsets = [0, 32], sizes = [8, 32], strides = [1, 1]} : vector<8x128xf32> to vector<8x32xf32>
    %132 = vector.extract_strided_slice %129 {offsets = [0, 64], sizes = [8, 32], strides = [1, 1]} : vector<8x128xf32> to vector<8x32xf32>
    %133 = vector.extract_strided_slice %128 {offsets = [0, 96], sizes = [8, 32], strides = [1, 1]} : vector<8x128xf32> to vector<8x32xf32>
    %134 = arith.mulf %131, %113 : vector<8x32xf32>
    %135 = arith.mulf %130, %132 : vector<8x32xf32>
    %136 = arith.addf %134, %135 : vector<8x32xf32>
    %137 = math.tanh %136 : vector<8x32xf32>
    %138 = arith.mulf %133, %137 : vector<8x32xf32>
    %139 = arith.index_cast %119 : i32 to index
    %c0_40 = arith.constant 0 : index
    %140 = vector.load %arg5[%139, %c0_40] : memref<64x32xf32, #tpu.memory_space<vmem>>, vector<8x32xf32>
    tpu.vector_store %arg5[%139, %c0_40], %138 {strides = array<i32>} : memref<64x32xf32, #tpu.memory_space<vmem>>, vector<8x32xf32>,
    %c6_i32 = arith.constant 6 : i32
    %c8_i32_41 = arith.constant 8 : i32
    %141 = arith.muli %c6_i32, %c8_i32_41 : i32
    %142 = tpu.assume_multiple %141, 8 : i32
    %143 = arith.index_cast %142 : i32 to index
    %c0_42 = arith.constant 0 : index
    %144 = vector.load %arg6[%143, %c0_42] : memref<64x128xf32, #tpu.memory_space<vmem>>, vector<8x128xf32>
    %cst_43 = arith.constant dense<0.000000e+00> : vector<8x128xf32>
    %145 = tpu.matmul %138, %3, %cst_43 {dimension_numbers = #tpu.dot_dimension_numbers<[1], [0], [0], [1], [0, 0, 1, 1], [], []>} : vector<8x32xf32>, vector<32x128xf32>, vector<8x128xf32> -> vector<8x128xf32>
    %146 = arith.addf %144, %145 : vector<8x128xf32>
    %147 = arith.negf %146 : vector<8x128xf32>
    %148 = math.exp %147 : vector<8x128xf32>
    %cst_44 = arith.constant 1.000000e+00 : f32
    %149 = vector.broadcast %cst_44 : f32 to vector<8x128xf32>
    %150 = arith.addf %149, %148 : vector<8x128xf32>
    %151 = arith.divf %149, %150 : vector<8x128xf32>
    %152 = math.tanh %146 : vector<8x128xf32>
    %153 = vector.extract_strided_slice %151 {offsets = [0, 0], sizes = [8, 32], strides = [1, 1]} : vector<8x128xf32> to vector<8x32xf32>
    %154 = vector.extract_strided_slice %151 {offsets = [0, 32], sizes = [8, 32], strides = [1, 1]} : vector<8x128xf32> to vector<8x32xf32>
    %155 = vector.extract_strided_slice %152 {offsets = [0, 64], sizes = [8, 32], strides = [1, 1]} : vector<8x128xf32> to vector<8x32xf32>
    %156 = vector.extract_strided_slice %151 {offsets = [0, 96], sizes = [8, 32], strides = [1, 1]} : vector<8x128xf32> to vector<8x32xf32>
    %157 = arith.mulf %154, %136 : vector<8x32xf32>
    %158 = arith.mulf %153, %155 : vector<8x32xf32>
    %159 = arith.addf %157, %158 : vector<8x32xf32>
    %160 = math.tanh %159 : vector<8x32xf32>
    %161 = arith.mulf %156, %160 : vector<8x32xf32>
    %162 = arith.index_cast %142 : i32 to index
    %c0_45 = arith.constant 0 : index
    %163 = vector.load %arg5[%162, %c0_45] : memref<64x32xf32, #tpu.memory_space<vmem>>, vector<8x32xf32>
    tpu.vector_store %arg5[%162, %c0_45], %161 {strides = array<i32>} : memref<64x32xf32, #tpu.memory_space<vmem>>, vector<8x32xf32>,
    %c7_i32 = arith.constant 7 : i32
    %c8_i32_46 = arith.constant 8 : i32
    %164 = arith.muli %c7_i32, %c8_i32_46 : i32
    %165 = tpu.assume_multiple %164, 8 : i32
    %166 = arith.index_cast %165 : i32 to index
    %c0_47 = arith.constant 0 : index
    %167 = vector.load %arg6[%166, %c0_47] : memref<64x128xf32, #tpu.memory_space<vmem>>, vector<8x128xf32>
    %cst_48 = arith.constant dense<0.000000e+00> : vector<8x128xf32>
    %168 = tpu.matmul %161, %3, %cst_48 {dimension_numbers = #tpu.dot_dimension_numbers<[1], [0], [0], [1], [0, 0, 1, 1], [], []>} : vector<8x32xf32>, vector<32x128xf32>, vector<8x128xf32> -> vector<8x128xf32>
    %169 = arith.addf %167, %168 : vector<8x128xf32>
    %170 = arith.negf %169 : vector<8x128xf32>
    %171 = math.exp %170 : vector<8x128xf32>
    %cst_49 = arith.constant 1.000000e+00 : f32
    %172 = vector.broadcast %cst_49 : f32 to vector<8x128xf32>
    %173 = arith.addf %172, %171 : vector<8x128xf32>
    %174 = arith.divf %172, %173 : vector<8x128xf32>
    %175 = math.tanh %169 : vector<8x128xf32>
    %176 = vector.extract_strided_slice %174 {offsets = [0, 0], sizes = [8, 32], strides = [1, 1]} : vector<8x128xf32> to vector<8x32xf32>
    %177 = vector.extract_strided_slice %174 {offsets = [0, 32], sizes = [8, 32], strides = [1, 1]} : vector<8x128xf32> to vector<8x32xf32>
    %178 = vector.extract_strided_slice %175 {offsets = [0, 64], sizes = [8, 32], strides = [1, 1]} : vector<8x128xf32> to vector<8x32xf32>
    %179 = vector.extract_strided_slice %174 {offsets = [0, 96], sizes = [8, 32], strides = [1, 1]} : vector<8x128xf32> to vector<8x32xf32>
    %180 = arith.mulf %177, %159 : vector<8x32xf32>
    %181 = arith.mulf %176, %178 : vector<8x32xf32>
    %182 = arith.addf %180, %181 : vector<8x32xf32>
    %183 = math.tanh %182 : vector<8x32xf32>
    %184 = arith.mulf %179, %183 : vector<8x32xf32>
    %185 = arith.index_cast %165 : i32 to index
    %c0_50 = arith.constant 0 : index
    %186 = vector.load %arg5[%185, %c0_50] : memref<64x32xf32, #tpu.memory_space<vmem>>, vector<8x32xf32>
    tpu.vector_store %arg5[%185, %c0_50], %184 {strides = array<i32>} : memref<64x32xf32, #tpu.memory_space<vmem>>, vector<8x32xf32>,
    %c7_i32_51 = arith.constant 7 : i32
    %c1 = arith.constant 1 : index
    %c0_52 = arith.constant 0 : index
    %c0_53 = arith.constant 0 : index
    %187 = vector.load %arg2[%c1, %c0_52, %c0_53] : memref<3x32x128xbf16, #tpu.memory_space<vmem>>, vector<1x32x128xbf16>
    %188 = vector.shape_cast %187 : vector<1x32x128xbf16> to vector<32x128xbf16>
    %c1_54 = arith.constant 1 : index
    %c0_55 = arith.constant 0 : index
    %c0_56 = arith.constant 0 : index
    %189 = vector.load %arg3[%c1_54, %c0_55, %c0_56] : memref<3x32x128xf32, #tpu.memory_space<vmem>>, vector<1x32x128xf32>
    %190 = vector.shape_cast %189 : vector<1x32x128xf32> to vector<32x128xf32>
    %c1_57 = arith.constant 1 : index
    %c0_58 = arith.constant 0 : index
    %c0_59 = arith.constant 0 : index
    %191 = vector.load %arg4[%c1_57, %c0_58, %c0_59] : memref<3x1x128xf32, #tpu.memory_space<vmem>>, vector<1x1x128xf32>
    %192 = vector.shape_cast %191 : vector<1x1x128xf32> to vector<1x128xf32>
    %c0_60 = arith.constant 0 : index
    %c0_61 = arith.constant 0 : index
    %193 = vector.load %arg5[%c0_60, %c0_61] : memref<64x32xf32, #tpu.memory_space<vmem>>, vector<64x32xf32>
    %194 = arith.truncf %193 : vector<64x32xf32> to vector<64x32xbf16>
    %cst_62 = arith.constant dense<0.000000e+00> : vector<64x128xf32>
    %195 = tpu.matmul %194, %188, %cst_62 {dimension_numbers = #tpu.dot_dimension_numbers<[1], [0], [0], [1], [0, 0, 1, 1], [], []>} : vector<64x32xbf16>, vector<32x128xbf16>, vector<64x128xf32> -> vector<64x128xf32>
    %196 = vector.broadcast %192 : vector<1x128xf32> to vector<64x128xf32>
    %197 = arith.addf %195, %196 : vector<64x128xf32>
    %c0_63 = arith.constant 0 : index
    %c0_64 = arith.constant 0 : index
    %198 = vector.load %arg6[%c0_63, %c0_64] : memref<64x128xf32, #tpu.memory_space<vmem>>, vector<64x128xf32>
    tpu.vector_store %arg6[%c0_63, %c0_64], %197 {strides = array<i32>} : memref<64x128xf32, #tpu.memory_space<vmem>>, vector<64x128xf32>,
    %c0_65 = arith.constant 0 : index
    %c0_66 = arith.constant 0 : index
    %199 = vector.load %arg6[%c0_65, %c0_66] : memref<64x128xf32, #tpu.memory_space<vmem>>, vector<8x128xf32>
    %200 = arith.negf %199 : vector<8x128xf32>
    %201 = math.exp %200 : vector<8x128xf32>
    %cst_67 = arith.constant 1.000000e+00 : f32
    %202 = vector.broadcast %cst_67 : f32 to vector<8x128xf32>
    %203 = arith.addf %202, %201 : vector<8x128xf32>
    %204 = arith.divf %202, %203 : vector<8x128xf32>
    %205 = math.tanh %199 : vector<8x128xf32>
    %206 = vector.extract_strided_slice %204 {offsets = [0, 0], sizes = [8, 32], strides = [1, 1]} : vector<8x128xf32> to vector<8x32xf32>
    %207 = vector.extract_strided_slice %205 {offsets = [0, 64], sizes = [8, 32], strides = [1, 1]} : vector<8x128xf32> to vector<8x32xf32>
    %208 = vector.extract_strided_slice %204 {offsets = [0, 96], sizes = [8, 32], strides = [1, 1]} : vector<8x128xf32> to vector<8x32xf32>
    %209 = arith.mulf %206, %207 : vector<8x32xf32>
    %210 = math.tanh %209 : vector<8x32xf32>
    %211 = arith.mulf %208, %210 : vector<8x32xf32>
    %c0_68 = arith.constant 0 : index
    %c0_69 = arith.constant 0 : index
    %212 = vector.load %arg5[%c0_68, %c0_69] : memref<64x32xf32, #tpu.memory_space<vmem>>, vector<8x32xf32>
    tpu.vector_store %arg5[%c0_68, %c0_69], %211 {strides = array<i32>} : memref<64x32xf32, #tpu.memory_space<vmem>>, vector<8x32xf32>,
    %c1_i32_70 = arith.constant 1 : i32
    %c8_i32_71 = arith.constant 8 : i32
    %213 = arith.muli %c1_i32_70, %c8_i32_71 : i32
    %214 = tpu.assume_multiple %213, 8 : i32
    %215 = arith.index_cast %214 : i32 to index
    %c0_72 = arith.constant 0 : index
    %216 = vector.load %arg6[%215, %c0_72] : memref<64x128xf32, #tpu.memory_space<vmem>>, vector<8x128xf32>
    %cst_73 = arith.constant dense<0.000000e+00> : vector<8x128xf32>
    %217 = tpu.matmul %211, %190, %cst_73 {dimension_numbers = #tpu.dot_dimension_numbers<[1], [0], [0], [1], [0, 0, 1, 1], [], []>} : vector<8x32xf32>, vector<32x128xf32>, vector<8x128xf32> -> vector<8x128xf32>
    %218 = arith.addf %216, %217 : vector<8x128xf32>
    %219 = arith.negf %218 : vector<8x128xf32>
    %220 = math.exp %219 : vector<8x128xf32>
    %cst_74 = arith.constant 1.000000e+00 : f32
    %221 = vector.broadcast %cst_74 : f32 to vector<8x128xf32>
    %222 = arith.addf %221, %220 : vector<8x128xf32>
    %223 = arith.divf %221, %222 : vector<8x128xf32>
    %224 = math.tanh %218 : vector<8x128xf32>
    %225 = vector.extract_strided_slice %223 {offsets = [0, 0], sizes = [8, 32], strides = [1, 1]} : vector<8x128xf32> to vector<8x32xf32>
    %226 = vector.extract_strided_slice %223 {offsets = [0, 32], sizes = [8, 32], strides = [1, 1]} : vector<8x128xf32> to vector<8x32xf32>
    %227 = vector.extract_strided_slice %224 {offsets = [0, 64], sizes = [8, 32], strides = [1, 1]} : vector<8x128xf32> to vector<8x32xf32>
    %228 = vector.extract_strided_slice %223 {offsets = [0, 96], sizes = [8, 32], strides = [1, 1]} : vector<8x128xf32> to vector<8x32xf32>
    %229 = arith.mulf %226, %209 : vector<8x32xf32>
    %230 = arith.mulf %225, %227 : vector<8x32xf32>
    %231 = arith.addf %229, %230 : vector<8x32xf32>
    %232 = math.tanh %231 : vector<8x32xf32>
    %233 = arith.mulf %228, %232 : vector<8x32xf32>
    %234 = arith.index_cast %214 : i32 to index
    %c0_75 = arith.constant 0 : index
    %235 = vector.load %arg5[%234, %c0_75] : memref<64x32xf32, #tpu.memory_space<vmem>>, vector<8x32xf32>
    tpu.vector_store %arg5[%234, %c0_75], %233 {strides = array<i32>} : memref<64x32xf32, #tpu.memory_space<vmem>>, vector<8x32xf32>,
    %c2_i32_76 = arith.constant 2 : i32
    %c8_i32_77 = arith.constant 8 : i32
    %236 = arith.muli %c2_i32_76, %c8_i32_77 : i32
    %237 = tpu.assume_multiple %236, 8 : i32
    %238 = arith.index_cast %237 : i32 to index
    %c0_78 = arith.constant 0 : index
    %239 = vector.load %arg6[%238, %c0_78] : memref<64x128xf32, #tpu.memory_space<vmem>>, vector<8x128xf32>
    %cst_79 = arith.constant dense<0.000000e+00> : vector<8x128xf32>
    %240 = tpu.matmul %233, %190, %cst_79 {dimension_numbers = #tpu.dot_dimension_numbers<[1], [0], [0], [1], [0, 0, 1, 1], [], []>} : vector<8x32xf32>, vector<32x128xf32>, vector<8x128xf32> -> vector<8x128xf32>
    %241 = arith.addf %239, %240 : vector<8x128xf32>
    %242 = arith.negf %241 : vector<8x128xf32>
    %243 = math.exp %242 : vector<8x128xf32>
    %cst_80 = arith.constant 1.000000e+00 : f32
    %244 = vector.broadcast %cst_80 : f32 to vector<8x128xf32>
    %245 = arith.addf %244, %243 : vector<8x128xf32>
    %246 = arith.divf %244, %245 : vector<8x128xf32>
    %247 = math.tanh %241 : vector<8x128xf32>
    %248 = vector.extract_strided_slice %246 {offsets = [0, 0], sizes = [8, 32], strides = [1, 1]} : vector<8x128xf32> to vector<8x32xf32>
    %249 = vector.extract_strided_slice %246 {offsets = [0, 32], sizes = [8, 32], strides = [1, 1]} : vector<8x128xf32> to vector<8x32xf32>
    %250 = vector.extract_strided_slice %247 {offsets = [0, 64], sizes = [8, 32], strides = [1, 1]} : vector<8x128xf32> to vector<8x32xf32>
    %251 = vector.extract_strided_slice %246 {offsets = [0, 96], sizes = [8, 32], strides = [1, 1]} : vector<8x128xf32> to vector<8x32xf32>
    %252 = arith.mulf %249, %231 : vector<8x32xf32>
    %253 = arith.mulf %248, %250 : vector<8x32xf32>
    %254 = arith.addf %252, %253 : vector<8x32xf32>
    %255 = math.tanh %254 : vector<8x32xf32>
    %256 = arith.mulf %251, %255 : vector<8x32xf32>
    %257 = arith.index_cast %237 : i32 to index
    %c0_81 = arith.constant 0 : index
    %258 = vector.load %arg5[%257, %c0_81] : memref<64x32xf32, #tpu.memory_space<vmem>>, vector<8x32xf32>
    tpu.vector_store %arg5[%257, %c0_81], %256 {strides = array<i32>} : memref<64x32xf32, #tpu.memory_space<vmem>>, vector<8x32xf32>,
    %c3_i32_82 = arith.constant 3 : i32
    %c8_i32_83 = arith.constant 8 : i32
    %259 = arith.muli %c3_i32_82, %c8_i32_83 : i32
    %260 = tpu.assume_multiple %259, 8 : i32
    %261 = arith.index_cast %260 : i32 to index
    %c0_84 = arith.constant 0 : index
    %262 = vector.load %arg6[%261, %c0_84] : memref<64x128xf32, #tpu.memory_space<vmem>>, vector<8x128xf32>
    %cst_85 = arith.constant dense<0.000000e+00> : vector<8x128xf32>
    %263 = tpu.matmul %256, %190, %cst_85 {dimension_numbers = #tpu.dot_dimension_numbers<[1], [0], [0], [1], [0, 0, 1, 1], [], []>} : vector<8x32xf32>, vector<32x128xf32>, vector<8x128xf32> -> vector<8x128xf32>
    %264 = arith.addf %262, %263 : vector<8x128xf32>
    %265 = arith.negf %264 : vector<8x128xf32>
    %266 = math.exp %265 : vector<8x128xf32>
    %cst_86 = arith.constant 1.000000e+00 : f32
    %267 = vector.broadcast %cst_86 : f32 to vector<8x128xf32>
    %268 = arith.addf %267, %266 : vector<8x128xf32>
    %269 = arith.divf %267, %268 : vector<8x128xf32>
    %270 = math.tanh %264 : vector<8x128xf32>
    %271 = vector.extract_strided_slice %269 {offsets = [0, 0], sizes = [8, 32], strides = [1, 1]} : vector<8x128xf32> to vector<8x32xf32>
    %272 = vector.extract_strided_slice %269 {offsets = [0, 32], sizes = [8, 32], strides = [1, 1]} : vector<8x128xf32> to vector<8x32xf32>
    %273 = vector.extract_strided_slice %270 {offsets = [0, 64], sizes = [8, 32], strides = [1, 1]} : vector<8x128xf32> to vector<8x32xf32>
    %274 = vector.extract_strided_slice %269 {offsets = [0, 96], sizes = [8, 32], strides = [1, 1]} : vector<8x128xf32> to vector<8x32xf32>
    %275 = arith.mulf %272, %254 : vector<8x32xf32>
    %276 = arith.mulf %271, %273 : vector<8x32xf32>
    %277 = arith.addf %275, %276 : vector<8x32xf32>
    %278 = math.tanh %277 : vector<8x32xf32>
    %279 = arith.mulf %274, %278 : vector<8x32xf32>
    %280 = arith.index_cast %260 : i32 to index
    %c0_87 = arith.constant 0 : index
    %281 = vector.load %arg5[%280, %c0_87] : memref<64x32xf32, #tpu.memory_space<vmem>>, vector<8x32xf32>
    tpu.vector_store %arg5[%280, %c0_87], %279 {strides = array<i32>} : memref<64x32xf32, #tpu.memory_space<vmem>>, vector<8x32xf32>,
    %c4_i32_88 = arith.constant 4 : i32
    %c8_i32_89 = arith.constant 8 : i32
    %282 = arith.muli %c4_i32_88, %c8_i32_89 : i32
    %283 = tpu.assume_multiple %282, 8 : i32
    %284 = arith.index_cast %283 : i32 to index
    %c0_90 = arith.constant 0 : index
    %285 = vector.load %arg6[%284, %c0_90] : memref<64x128xf32, #tpu.memory_space<vmem>>, vector<8x128xf32>
    %cst_91 = arith.constant dense<0.000000e+00> : vector<8x128xf32>
    %286 = tpu.matmul %279, %190, %cst_91 {dimension_numbers = #tpu.dot_dimension_numbers<[1], [0], [0], [1], [0, 0, 1, 1], [], []>} : vector<8x32xf32>, vector<32x128xf32>, vector<8x128xf32> -> vector<8x128xf32>
    %287 = arith.addf %285, %286 : vector<8x128xf32>
    %288 = arith.negf %287 : vector<8x128xf32>
    %289 = math.exp %288 : vector<8x128xf32>
    %cst_92 = arith.constant 1.000000e+00 : f32
    %290 = vector.broadcast %cst_92 : f32 to vector<8x128xf32>
    %291 = arith.addf %290, %289 : vector<8x128xf32>
    %292 = arith.divf %290, %291 : vector<8x128xf32>
    %293 = math.tanh %287 : vector<8x128xf32>
    %294 = vector.extract_strided_slice %292 {offsets = [0, 0], sizes = [8, 32], strides = [1, 1]} : vector<8x128xf32> to vector<8x32xf32>
    %295 = vector.extract_strided_slice %292 {offsets = [0, 32], sizes = [8, 32], strides = [1, 1]} : vector<8x128xf32> to vector<8x32xf32>
    %296 = vector.extract_strided_slice %293 {offsets = [0, 64], sizes = [8, 32], strides = [1, 1]} : vector<8x128xf32> to vector<8x32xf32>
    %297 = vector.extract_strided_slice %292 {offsets = [0, 96], sizes = [8, 32], strides = [1, 1]} : vector<8x128xf32> to vector<8x32xf32>
    %298 = arith.mulf %295, %277 : vector<8x32xf32>
    %299 = arith.mulf %294, %296 : vector<8x32xf32>
    %300 = arith.addf %298, %299 : vector<8x32xf32>
    %301 = math.tanh %300 : vector<8x32xf32>
    %302 = arith.mulf %297, %301 : vector<8x32xf32>
    %303 = arith.index_cast %283 : i32 to index
    %c0_93 = arith.constant 0 : index
    %304 = vector.load %arg5[%303, %c0_93] : memref<64x32xf32, #tpu.memory_space<vmem>>, vector<8x32xf32>
    tpu.vector_store %arg5[%303, %c0_93], %302 {strides = array<i32>} : memref<64x32xf32, #tpu.memory_space<vmem>>, vector<8x32xf32>,
    %c5_i32_94 = arith.constant 5 : i32
    %c8_i32_95 = arith.constant 8 : i32
    %305 = arith.muli %c5_i32_94, %c8_i32_95 : i32
    %306 = tpu.assume_multiple %305, 8 : i32
    %307 = arith.index_cast %306 : i32 to index
    %c0_96 = arith.constant 0 : index
    %308 = vector.load %arg6[%307, %c0_96] : memref<64x128xf32, #tpu.memory_space<vmem>>, vector<8x128xf32>
    %cst_97 = arith.constant dense<0.000000e+00> : vector<8x128xf32>
    %309 = tpu.matmul %302, %190, %cst_97 {dimension_numbers = #tpu.dot_dimension_numbers<[1], [0], [0], [1], [0, 0, 1, 1], [], []>} : vector<8x32xf32>, vector<32x128xf32>, vector<8x128xf32> -> vector<8x128xf32>
    %310 = arith.addf %308, %309 : vector<8x128xf32>
    %311 = arith.negf %310 : vector<8x128xf32>
    %312 = math.exp %311 : vector<8x128xf32>
    %cst_98 = arith.constant 1.000000e+00 : f32
    %313 = vector.broadcast %cst_98 : f32 to vector<8x128xf32>
    %314 = arith.addf %313, %312 : vector<8x128xf32>
    %315 = arith.divf %313, %314 : vector<8x128xf32>
    %316 = math.tanh %310 : vector<8x128xf32>
    %317 = vector.extract_strided_slice %315 {offsets = [0, 0], sizes = [8, 32], strides = [1, 1]} : vector<8x128xf32> to vector<8x32xf32>
    %318 = vector.extract_strided_slice %315 {offsets = [0, 32], sizes = [8, 32], strides = [1, 1]} : vector<8x128xf32> to vector<8x32xf32>
    %319 = vector.extract_strided_slice %316 {offsets = [0, 64], sizes = [8, 32], strides = [1, 1]} : vector<8x128xf32> to vector<8x32xf32>
    %320 = vector.extract_strided_slice %315 {offsets = [0, 96], sizes = [8, 32], strides = [1, 1]} : vector<8x128xf32> to vector<8x32xf32>
    %321 = arith.mulf %318, %300 : vector<8x32xf32>
    %322 = arith.mulf %317, %319 : vector<8x32xf32>
    %323 = arith.addf %321, %322 : vector<8x32xf32>
    %324 = math.tanh %323 : vector<8x32xf32>
    %325 = arith.mulf %320, %324 : vector<8x32xf32>
    %326 = arith.index_cast %306 : i32 to index
    %c0_99 = arith.constant 0 : index
    %327 = vector.load %arg5[%326, %c0_99] : memref<64x32xf32, #tpu.memory_space<vmem>>, vector<8x32xf32>
    tpu.vector_store %arg5[%326, %c0_99], %325 {strides = array<i32>} : memref<64x32xf32, #tpu.memory_space<vmem>>, vector<8x32xf32>,
    %c6_i32_100 = arith.constant 6 : i32
    %c8_i32_101 = arith.constant 8 : i32
    %328 = arith.muli %c6_i32_100, %c8_i32_101 : i32
    %329 = tpu.assume_multiple %328, 8 : i32
    %330 = arith.index_cast %329 : i32 to index
    %c0_102 = arith.constant 0 : index
    %331 = vector.load %arg6[%330, %c0_102] : memref<64x128xf32, #tpu.memory_space<vmem>>, vector<8x128xf32>
    %cst_103 = arith.constant dense<0.000000e+00> : vector<8x128xf32>
    %332 = tpu.matmul %325, %190, %cst_103 {dimension_numbers = #tpu.dot_dimension_numbers<[1], [0], [0], [1], [0, 0, 1, 1], [], []>} : vector<8x32xf32>, vector<32x128xf32>, vector<8x128xf32> -> vector<8x128xf32>
    %333 = arith.addf %331, %332 : vector<8x128xf32>
    %334 = arith.negf %333 : vector<8x128xf32>
    %335 = math.exp %334 : vector<8x128xf32>
    %cst_104 = arith.constant 1.000000e+00 : f32
    %336 = vector.broadcast %cst_104 : f32 to vector<8x128xf32>
    %337 = arith.addf %336, %335 : vector<8x128xf32>
    %338 = arith.divf %336, %337 : vector<8x128xf32>
    %339 = math.tanh %333 : vector<8x128xf32>
    %340 = vector.extract_strided_slice %338 {offsets = [0, 0], sizes = [8, 32], strides = [1, 1]} : vector<8x128xf32> to vector<8x32xf32>
    %341 = vector.extract_strided_slice %338 {offsets = [0, 32], sizes = [8, 32], strides = [1, 1]} : vector<8x128xf32> to vector<8x32xf32>
    %342 = vector.extract_strided_slice %339 {offsets = [0, 64], sizes = [8, 32], strides = [1, 1]} : vector<8x128xf32> to vector<8x32xf32>
    %343 = vector.extract_strided_slice %338 {offsets = [0, 96], sizes = [8, 32], strides = [1, 1]} : vector<8x128xf32> to vector<8x32xf32>
    %344 = arith.mulf %341, %323 : vector<8x32xf32>
    %345 = arith.mulf %340, %342 : vector<8x32xf32>
    %346 = arith.addf %344, %345 : vector<8x32xf32>
    %347 = math.tanh %346 : vector<8x32xf32>
    %348 = arith.mulf %343, %347 : vector<8x32xf32>
    %349 = arith.index_cast %329 : i32 to index
    %c0_105 = arith.constant 0 : index
    %350 = vector.load %arg5[%349, %c0_105] : memref<64x32xf32, #tpu.memory_space<vmem>>, vector<8x32xf32>
    tpu.vector_store %arg5[%349, %c0_105], %348 {strides = array<i32>} : memref<64x32xf32, #tpu.memory_space<vmem>>, vector<8x32xf32>,
    %c7_i32_106 = arith.constant 7 : i32
    %c8_i32_107 = arith.constant 8 : i32
    %351 = arith.muli %c7_i32_106, %c8_i32_107 : i32
    %352 = tpu.assume_multiple %351, 8 : i32
    %353 = arith.index_cast %352 : i32 to index
    %c0_108 = arith.constant 0 : index
    %354 = vector.load %arg6[%353, %c0_108] : memref<64x128xf32, #tpu.memory_space<vmem>>, vector<8x128xf32>
    %cst_109 = arith.constant dense<0.000000e+00> : vector<8x128xf32>
    %355 = tpu.matmul %348, %190, %cst_109 {dimension_numbers = #tpu.dot_dimension_numbers<[1], [0], [0], [1], [0, 0, 1, 1], [], []>} : vector<8x32xf32>, vector<32x128xf32>, vector<8x128xf32> -> vector<8x128xf32>
    %356 = arith.addf %354, %355 : vector<8x128xf32>
    %357 = arith.negf %356 : vector<8x128xf32>
    %358 = math.exp %357 : vector<8x128xf32>
    %cst_110 = arith.constant 1.000000e+00 : f32
    %359 = vector.broadcast %cst_110 : f32 to vector<8x128xf32>
    %360 = arith.addf %359, %358 : vector<8x128xf32>
    %361 = arith.divf %359, %360 : vector<8x128xf32>
    %362 = math.tanh %356 : vector<8x128xf32>
    %363 = vector.extract_strided_slice %361 {offsets = [0, 0], sizes = [8, 32], strides = [1, 1]} : vector<8x128xf32> to vector<8x32xf32>
    %364 = vector.extract_strided_slice %361 {offsets = [0, 32], sizes = [8, 32], strides = [1, 1]} : vector<8x128xf32> to vector<8x32xf32>
    %365 = vector.extract_strided_slice %362 {offsets = [0, 64], sizes = [8, 32], strides = [1, 1]} : vector<8x128xf32> to vector<8x32xf32>
    %366 = vector.extract_strided_slice %361 {offsets = [0, 96], sizes = [8, 32], strides = [1, 1]} : vector<8x128xf32> to vector<8x32xf32>
    %367 = arith.mulf %364, %346 : vector<8x32xf32>
    %368 = arith.mulf %363, %365 : vector<8x32xf32>
    %369 = arith.addf %367, %368 : vector<8x32xf32>
    %370 = math.tanh %369 : vector<8x32xf32>
    %371 = arith.mulf %366, %370 : vector<8x32xf32>
    %372 = arith.index_cast %352 : i32 to index
    %c0_111 = arith.constant 0 : index
    %373 = vector.load %arg5[%372, %c0_111] : memref<64x32xf32, #tpu.memory_space<vmem>>, vector<8x32xf32>
    tpu.vector_store %arg5[%372, %c0_111], %371 {strides = array<i32>} : memref<64x32xf32, #tpu.memory_space<vmem>>, vector<8x32xf32>,
    %c7_i32_112 = arith.constant 7 : i32
    %c2 = arith.constant 2 : index
    %c0_113 = arith.constant 0 : index
    %c0_114 = arith.constant 0 : index
    %374 = vector.load %arg2[%c2, %c0_113, %c0_114] : memref<3x32x128xbf16, #tpu.memory_space<vmem>>, vector<1x32x128xbf16>
    %375 = vector.shape_cast %374 : vector<1x32x128xbf16> to vector<32x128xbf16>
    %c2_115 = arith.constant 2 : index
    %c0_116 = arith.constant 0 : index
    %c0_117 = arith.constant 0 : index
    %376 = vector.load %arg3[%c2_115, %c0_116, %c0_117] : memref<3x32x128xf32, #tpu.memory_space<vmem>>, vector<1x32x128xf32>
    %377 = vector.shape_cast %376 : vector<1x32x128xf32> to vector<32x128xf32>
    %c2_118 = arith.constant 2 : index
    %c0_119 = arith.constant 0 : index
    %c0_120 = arith.constant 0 : index
    %378 = vector.load %arg4[%c2_118, %c0_119, %c0_120] : memref<3x1x128xf32, #tpu.memory_space<vmem>>, vector<1x1x128xf32>
    %379 = vector.shape_cast %378 : vector<1x1x128xf32> to vector<1x128xf32>
    %c0_121 = arith.constant 0 : index
    %c0_122 = arith.constant 0 : index
    %380 = vector.load %arg5[%c0_121, %c0_122] : memref<64x32xf32, #tpu.memory_space<vmem>>, vector<64x32xf32>
    %381 = arith.truncf %380 : vector<64x32xf32> to vector<64x32xbf16>
    %cst_123 = arith.constant dense<0.000000e+00> : vector<64x128xf32>
    %382 = tpu.matmul %381, %375, %cst_123 {dimension_numbers = #tpu.dot_dimension_numbers<[1], [0], [0], [1], [0, 0, 1, 1], [], []>} : vector<64x32xbf16>, vector<32x128xbf16>, vector<64x128xf32> -> vector<64x128xf32>
    %383 = vector.broadcast %379 : vector<1x128xf32> to vector<64x128xf32>
    %384 = arith.addf %382, %383 : vector<64x128xf32>
    %c0_124 = arith.constant 0 : index
    %c0_125 = arith.constant 0 : index
    %385 = vector.load %arg6[%c0_124, %c0_125] : memref<64x128xf32, #tpu.memory_space<vmem>>, vector<64x128xf32>
    tpu.vector_store %arg6[%c0_124, %c0_125], %384 {strides = array<i32>} : memref<64x128xf32, #tpu.memory_space<vmem>>, vector<64x128xf32>,
    %c0_126 = arith.constant 0 : index
    %c0_127 = arith.constant 0 : index
    %386 = vector.load %arg6[%c0_126, %c0_127] : memref<64x128xf32, #tpu.memory_space<vmem>>, vector<8x128xf32>
    %387 = arith.negf %386 : vector<8x128xf32>
    %388 = math.exp %387 : vector<8x128xf32>
    %cst_128 = arith.constant 1.000000e+00 : f32
    %389 = vector.broadcast %cst_128 : f32 to vector<8x128xf32>
    %390 = arith.addf %389, %388 : vector<8x128xf32>
    %391 = arith.divf %389, %390 : vector<8x128xf32>
    %392 = math.tanh %386 : vector<8x128xf32>
    %393 = vector.extract_strided_slice %391 {offsets = [0, 0], sizes = [8, 32], strides = [1, 1]} : vector<8x128xf32> to vector<8x32xf32>
    %394 = vector.extract_strided_slice %392 {offsets = [0, 64], sizes = [8, 32], strides = [1, 1]} : vector<8x128xf32> to vector<8x32xf32>
    %395 = vector.extract_strided_slice %391 {offsets = [0, 96], sizes = [8, 32], strides = [1, 1]} : vector<8x128xf32> to vector<8x32xf32>
    %396 = arith.mulf %393, %394 : vector<8x32xf32>
    %397 = math.tanh %396 : vector<8x32xf32>
    %398 = arith.mulf %395, %397 : vector<8x32xf32>
    %c0_129 = arith.constant 0 : index
    %c0_130 = arith.constant 0 : index
    %399 = vector.load %arg5[%c0_129, %c0_130] : memref<64x32xf32, #tpu.memory_space<vmem>>, vector<8x32xf32>
    tpu.vector_store %arg5[%c0_129, %c0_130], %398 {strides = array<i32>} : memref<64x32xf32, #tpu.memory_space<vmem>>, vector<8x32xf32>,
    %c1_i32_131 = arith.constant 1 : i32
    %c8_i32_132 = arith.constant 8 : i32
    %400 = arith.muli %c1_i32_131, %c8_i32_132 : i32
    %401 = tpu.assume_multiple %400, 8 : i32
    %402 = arith.index_cast %401 : i32 to index
    %c0_133 = arith.constant 0 : index
    %403 = vector.load %arg6[%402, %c0_133] : memref<64x128xf32, #tpu.memory_space<vmem>>, vector<8x128xf32>
    %cst_134 = arith.constant dense<0.000000e+00> : vector<8x128xf32>
    %404 = tpu.matmul %398, %377, %cst_134 {dimension_numbers = #tpu.dot_dimension_numbers<[1], [0], [0], [1], [0, 0, 1, 1], [], []>} : vector<8x32xf32>, vector<32x128xf32>, vector<8x128xf32> -> vector<8x128xf32>
    %405 = arith.addf %403, %404 : vector<8x128xf32>
    %406 = arith.negf %405 : vector<8x128xf32>
    %407 = math.exp %406 : vector<8x128xf32>
    %cst_135 = arith.constant 1.000000e+00 : f32
    %408 = vector.broadcast %cst_135 : f32 to vector<8x128xf32>
    %409 = arith.addf %408, %407 : vector<8x128xf32>
    %410 = arith.divf %408, %409 : vector<8x128xf32>
    %411 = math.tanh %405 : vector<8x128xf32>
    %412 = vector.extract_strided_slice %410 {offsets = [0, 0], sizes = [8, 32], strides = [1, 1]} : vector<8x128xf32> to vector<8x32xf32>
    %413 = vector.extract_strided_slice %410 {offsets = [0, 32], sizes = [8, 32], strides = [1, 1]} : vector<8x128xf32> to vector<8x32xf32>
    %414 = vector.extract_strided_slice %411 {offsets = [0, 64], sizes = [8, 32], strides = [1, 1]} : vector<8x128xf32> to vector<8x32xf32>
    %415 = vector.extract_strided_slice %410 {offsets = [0, 96], sizes = [8, 32], strides = [1, 1]} : vector<8x128xf32> to vector<8x32xf32>
    %416 = arith.mulf %413, %396 : vector<8x32xf32>
    %417 = arith.mulf %412, %414 : vector<8x32xf32>
    %418 = arith.addf %416, %417 : vector<8x32xf32>
    %419 = math.tanh %418 : vector<8x32xf32>
    %420 = arith.mulf %415, %419 : vector<8x32xf32>
    %421 = arith.index_cast %401 : i32 to index
    %c0_136 = arith.constant 0 : index
    %422 = vector.load %arg5[%421, %c0_136] : memref<64x32xf32, #tpu.memory_space<vmem>>, vector<8x32xf32>
    tpu.vector_store %arg5[%421, %c0_136], %420 {strides = array<i32>} : memref<64x32xf32, #tpu.memory_space<vmem>>, vector<8x32xf32>,
    %c2_i32_137 = arith.constant 2 : i32
    %c8_i32_138 = arith.constant 8 : i32
    %423 = arith.muli %c2_i32_137, %c8_i32_138 : i32
    %424 = tpu.assume_multiple %423, 8 : i32
    %425 = arith.index_cast %424 : i32 to index
    %c0_139 = arith.constant 0 : index
    %426 = vector.load %arg6[%425, %c0_139] : memref<64x128xf32, #tpu.memory_space<vmem>>, vector<8x128xf32>
    %cst_140 = arith.constant dense<0.000000e+00> : vector<8x128xf32>
    %427 = tpu.matmul %420, %377, %cst_140 {dimension_numbers = #tpu.dot_dimension_numbers<[1], [0], [0], [1], [0, 0, 1, 1], [], []>} : vector<8x32xf32>, vector<32x128xf32>, vector<8x128xf32> -> vector<8x128xf32>
    %428 = arith.addf %426, %427 : vector<8x128xf32>
    %429 = arith.negf %428 : vector<8x128xf32>
    %430 = math.exp %429 : vector<8x128xf32>
    %cst_141 = arith.constant 1.000000e+00 : f32
    %431 = vector.broadcast %cst_141 : f32 to vector<8x128xf32>
    %432 = arith.addf %431, %430 : vector<8x128xf32>
    %433 = arith.divf %431, %432 : vector<8x128xf32>
    %434 = math.tanh %428 : vector<8x128xf32>
    %435 = vector.extract_strided_slice %433 {offsets = [0, 0], sizes = [8, 32], strides = [1, 1]} : vector<8x128xf32> to vector<8x32xf32>
    %436 = vector.extract_strided_slice %433 {offsets = [0, 32], sizes = [8, 32], strides = [1, 1]} : vector<8x128xf32> to vector<8x32xf32>
    %437 = vector.extract_strided_slice %434 {offsets = [0, 64], sizes = [8, 32], strides = [1, 1]} : vector<8x128xf32> to vector<8x32xf32>
    %438 = vector.extract_strided_slice %433 {offsets = [0, 96], sizes = [8, 32], strides = [1, 1]} : vector<8x128xf32> to vector<8x32xf32>
    %439 = arith.mulf %436, %418 : vector<8x32xf32>
    %440 = arith.mulf %435, %437 : vector<8x32xf32>
    %441 = arith.addf %439, %440 : vector<8x32xf32>
    %442 = math.tanh %441 : vector<8x32xf32>
    %443 = arith.mulf %438, %442 : vector<8x32xf32>
    %444 = arith.index_cast %424 : i32 to index
    %c0_142 = arith.constant 0 : index
    %445 = vector.load %arg5[%444, %c0_142] : memref<64x32xf32, #tpu.memory_space<vmem>>, vector<8x32xf32>
    tpu.vector_store %arg5[%444, %c0_142], %443 {strides = array<i32>} : memref<64x32xf32, #tpu.memory_space<vmem>>, vector<8x32xf32>,
    %c3_i32_143 = arith.constant 3 : i32
    %c8_i32_144 = arith.constant 8 : i32
    %446 = arith.muli %c3_i32_143, %c8_i32_144 : i32
    %447 = tpu.assume_multiple %446, 8 : i32
    %448 = arith.index_cast %447 : i32 to index
    %c0_145 = arith.constant 0 : index
    %449 = vector.load %arg6[%448, %c0_145] : memref<64x128xf32, #tpu.memory_space<vmem>>, vector<8x128xf32>
    %cst_146 = arith.constant dense<0.000000e+00> : vector<8x128xf32>
    %450 = tpu.matmul %443, %377, %cst_146 {dimension_numbers = #tpu.dot_dimension_numbers<[1], [0], [0], [1], [0, 0, 1, 1], [], []>} : vector<8x32xf32>, vector<32x128xf32>, vector<8x128xf32> -> vector<8x128xf32>
    %451 = arith.addf %449, %450 : vector<8x128xf32>
    %452 = arith.negf %451 : vector<8x128xf32>
    %453 = math.exp %452 : vector<8x128xf32>
    %cst_147 = arith.constant 1.000000e+00 : f32
    %454 = vector.broadcast %cst_147 : f32 to vector<8x128xf32>
    %455 = arith.addf %454, %453 : vector<8x128xf32>
    %456 = arith.divf %454, %455 : vector<8x128xf32>
    %457 = math.tanh %451 : vector<8x128xf32>
    %458 = vector.extract_strided_slice %456 {offsets = [0, 0], sizes = [8, 32], strides = [1, 1]} : vector<8x128xf32> to vector<8x32xf32>
    %459 = vector.extract_strided_slice %456 {offsets = [0, 32], sizes = [8, 32], strides = [1, 1]} : vector<8x128xf32> to vector<8x32xf32>
    %460 = vector.extract_strided_slice %457 {offsets = [0, 64], sizes = [8, 32], strides = [1, 1]} : vector<8x128xf32> to vector<8x32xf32>
    %461 = vector.extract_strided_slice %456 {offsets = [0, 96], sizes = [8, 32], strides = [1, 1]} : vector<8x128xf32> to vector<8x32xf32>
    %462 = arith.mulf %459, %441 : vector<8x32xf32>
    %463 = arith.mulf %458, %460 : vector<8x32xf32>
    %464 = arith.addf %462, %463 : vector<8x32xf32>
    %465 = math.tanh %464 : vector<8x32xf32>
    %466 = arith.mulf %461, %465 : vector<8x32xf32>
    %467 = arith.index_cast %447 : i32 to index
    %c0_148 = arith.constant 0 : index
    %468 = vector.load %arg5[%467, %c0_148] : memref<64x32xf32, #tpu.memory_space<vmem>>, vector<8x32xf32>
    tpu.vector_store %arg5[%467, %c0_148], %466 {strides = array<i32>} : memref<64x32xf32, #tpu.memory_space<vmem>>, vector<8x32xf32>,
    %c4_i32_149 = arith.constant 4 : i32
    %c8_i32_150 = arith.constant 8 : i32
    %469 = arith.muli %c4_i32_149, %c8_i32_150 : i32
    %470 = tpu.assume_multiple %469, 8 : i32
    %471 = arith.index_cast %470 : i32 to index
    %c0_151 = arith.constant 0 : index
    %472 = vector.load %arg6[%471, %c0_151] : memref<64x128xf32, #tpu.memory_space<vmem>>, vector<8x128xf32>
    %cst_152 = arith.constant dense<0.000000e+00> : vector<8x128xf32>
    %473 = tpu.matmul %466, %377, %cst_152 {dimension_numbers = #tpu.dot_dimension_numbers<[1], [0], [0], [1], [0, 0, 1, 1], [], []>} : vector<8x32xf32>, vector<32x128xf32>, vector<8x128xf32> -> vector<8x128xf32>
    %474 = arith.addf %472, %473 : vector<8x128xf32>
    %475 = arith.negf %474 : vector<8x128xf32>
    %476 = math.exp %475 : vector<8x128xf32>
    %cst_153 = arith.constant 1.000000e+00 : f32
    %477 = vector.broadcast %cst_153 : f32 to vector<8x128xf32>
    %478 = arith.addf %477, %476 : vector<8x128xf32>
    %479 = arith.divf %477, %478 : vector<8x128xf32>
    %480 = math.tanh %474 : vector<8x128xf32>
    %481 = vector.extract_strided_slice %479 {offsets = [0, 0], sizes = [8, 32], strides = [1, 1]} : vector<8x128xf32> to vector<8x32xf32>
    %482 = vector.extract_strided_slice %479 {offsets = [0, 32], sizes = [8, 32], strides = [1, 1]} : vector<8x128xf32> to vector<8x32xf32>
    %483 = vector.extract_strided_slice %480 {offsets = [0, 64], sizes = [8, 32], strides = [1, 1]} : vector<8x128xf32> to vector<8x32xf32>
    %484 = vector.extract_strided_slice %479 {offsets = [0, 96], sizes = [8, 32], strides = [1, 1]} : vector<8x128xf32> to vector<8x32xf32>
    %485 = arith.mulf %482, %464 : vector<8x32xf32>
    %486 = arith.mulf %481, %483 : vector<8x32xf32>
    %487 = arith.addf %485, %486 : vector<8x32xf32>
    %488 = math.tanh %487 : vector<8x32xf32>
    %489 = arith.mulf %484, %488 : vector<8x32xf32>
    %490 = arith.index_cast %470 : i32 to index
    %c0_154 = arith.constant 0 : index
    %491 = vector.load %arg5[%490, %c0_154] : memref<64x32xf32, #tpu.memory_space<vmem>>, vector<8x32xf32>
    tpu.vector_store %arg5[%490, %c0_154], %489 {strides = array<i32>} : memref<64x32xf32, #tpu.memory_space<vmem>>, vector<8x32xf32>,
    %c5_i32_155 = arith.constant 5 : i32
    %c8_i32_156 = arith.constant 8 : i32
    %492 = arith.muli %c5_i32_155, %c8_i32_156 : i32
    %493 = tpu.assume_multiple %492, 8 : i32
    %494 = arith.index_cast %493 : i32 to index
    %c0_157 = arith.constant 0 : index
    %495 = vector.load %arg6[%494, %c0_157] : memref<64x128xf32, #tpu.memory_space<vmem>>, vector<8x128xf32>
    %cst_158 = arith.constant dense<0.000000e+00> : vector<8x128xf32>
    %496 = tpu.matmul %489, %377, %cst_158 {dimension_numbers = #tpu.dot_dimension_numbers<[1], [0], [0], [1], [0, 0, 1, 1], [], []>} : vector<8x32xf32>, vector<32x128xf32>, vector<8x128xf32> -> vector<8x128xf32>
    %497 = arith.addf %495, %496 : vector<8x128xf32>
    %498 = arith.negf %497 : vector<8x128xf32>
    %499 = math.exp %498 : vector<8x128xf32>
    %cst_159 = arith.constant 1.000000e+00 : f32
    %500 = vector.broadcast %cst_159 : f32 to vector<8x128xf32>
    %501 = arith.addf %500, %499 : vector<8x128xf32>
    %502 = arith.divf %500, %501 : vector<8x128xf32>
    %503 = math.tanh %497 : vector<8x128xf32>
    %504 = vector.extract_strided_slice %502 {offsets = [0, 0], sizes = [8, 32], strides = [1, 1]} : vector<8x128xf32> to vector<8x32xf32>
    %505 = vector.extract_strided_slice %502 {offsets = [0, 32], sizes = [8, 32], strides = [1, 1]} : vector<8x128xf32> to vector<8x32xf32>
    %506 = vector.extract_strided_slice %503 {offsets = [0, 64], sizes = [8, 32], strides = [1, 1]} : vector<8x128xf32> to vector<8x32xf32>
    %507 = vector.extract_strided_slice %502 {offsets = [0, 96], sizes = [8, 32], strides = [1, 1]} : vector<8x128xf32> to vector<8x32xf32>
    %508 = arith.mulf %505, %487 : vector<8x32xf32>
    %509 = arith.mulf %504, %506 : vector<8x32xf32>
    %510 = arith.addf %508, %509 : vector<8x32xf32>
    %511 = math.tanh %510 : vector<8x32xf32>
    %512 = arith.mulf %507, %511 : vector<8x32xf32>
    %513 = arith.index_cast %493 : i32 to index
    %c0_160 = arith.constant 0 : index
    %514 = vector.load %arg5[%513, %c0_160] : memref<64x32xf32, #tpu.memory_space<vmem>>, vector<8x32xf32>
    tpu.vector_store %arg5[%513, %c0_160], %512 {strides = array<i32>} : memref<64x32xf32, #tpu.memory_space<vmem>>, vector<8x32xf32>,
    %c6_i32_161 = arith.constant 6 : i32
    %c8_i32_162 = arith.constant 8 : i32
    %515 = arith.muli %c6_i32_161, %c8_i32_162 : i32
    %516 = tpu.assume_multiple %515, 8 : i32
    %517 = arith.index_cast %516 : i32 to index
    %c0_163 = arith.constant 0 : index
    %518 = vector.load %arg6[%517, %c0_163] : memref<64x128xf32, #tpu.memory_space<vmem>>, vector<8x128xf32>
    %cst_164 = arith.constant dense<0.000000e+00> : vector<8x128xf32>
    %519 = tpu.matmul %512, %377, %cst_164 {dimension_numbers = #tpu.dot_dimension_numbers<[1], [0], [0], [1], [0, 0, 1, 1], [], []>} : vector<8x32xf32>, vector<32x128xf32>, vector<8x128xf32> -> vector<8x128xf32>
    %520 = arith.addf %518, %519 : vector<8x128xf32>
    %521 = arith.negf %520 : vector<8x128xf32>
    %522 = math.exp %521 : vector<8x128xf32>
    %cst_165 = arith.constant 1.000000e+00 : f32
    %523 = vector.broadcast %cst_165 : f32 to vector<8x128xf32>
    %524 = arith.addf %523, %522 : vector<8x128xf32>
    %525 = arith.divf %523, %524 : vector<8x128xf32>
    %526 = math.tanh %520 : vector<8x128xf32>
    %527 = vector.extract_strided_slice %525 {offsets = [0, 0], sizes = [8, 32], strides = [1, 1]} : vector<8x128xf32> to vector<8x32xf32>
    %528 = vector.extract_strided_slice %525 {offsets = [0, 32], sizes = [8, 32], strides = [1, 1]} : vector<8x128xf32> to vector<8x32xf32>
    %529 = vector.extract_strided_slice %526 {offsets = [0, 64], sizes = [8, 32], strides = [1, 1]} : vector<8x128xf32> to vector<8x32xf32>
    %530 = vector.extract_strided_slice %525 {offsets = [0, 96], sizes = [8, 32], strides = [1, 1]} : vector<8x128xf32> to vector<8x32xf32>
    %531 = arith.mulf %528, %510 : vector<8x32xf32>
    %532 = arith.mulf %527, %529 : vector<8x32xf32>
    %533 = arith.addf %531, %532 : vector<8x32xf32>
    %534 = math.tanh %533 : vector<8x32xf32>
    %535 = arith.mulf %530, %534 : vector<8x32xf32>
    %536 = arith.index_cast %516 : i32 to index
    %c0_166 = arith.constant 0 : index
    %537 = vector.load %arg5[%536, %c0_166] : memref<64x32xf32, #tpu.memory_space<vmem>>, vector<8x32xf32>
    tpu.vector_store %arg5[%536, %c0_166], %535 {strides = array<i32>} : memref<64x32xf32, #tpu.memory_space<vmem>>, vector<8x32xf32>,
    %c7_i32_167 = arith.constant 7 : i32
    %c8_i32_168 = arith.constant 8 : i32
    %538 = arith.muli %c7_i32_167, %c8_i32_168 : i32
    %539 = tpu.assume_multiple %538, 8 : i32
    %540 = arith.index_cast %539 : i32 to index
    %c0_169 = arith.constant 0 : index
    %541 = vector.load %arg6[%540, %c0_169] : memref<64x128xf32, #tpu.memory_space<vmem>>, vector<8x128xf32>
    %cst_170 = arith.constant dense<0.000000e+00> : vector<8x128xf32>
    %542 = tpu.matmul %535, %377, %cst_170 {dimension_numbers = #tpu.dot_dimension_numbers<[1], [0], [0], [1], [0, 0, 1, 1], [], []>} : vector<8x32xf32>, vector<32x128xf32>, vector<8x128xf32> -> vector<8x128xf32>
    %543 = arith.addf %541, %542 : vector<8x128xf32>
    %544 = arith.negf %543 : vector<8x128xf32>
    %545 = math.exp %544 : vector<8x128xf32>
    %cst_171 = arith.constant 1.000000e+00 : f32
    %546 = vector.broadcast %cst_171 : f32 to vector<8x128xf32>
    %547 = arith.addf %546, %545 : vector<8x128xf32>
    %548 = arith.divf %546, %547 : vector<8x128xf32>
    %549 = math.tanh %543 : vector<8x128xf32>
    %550 = vector.extract_strided_slice %548 {offsets = [0, 0], sizes = [8, 32], strides = [1, 1]} : vector<8x128xf32> to vector<8x32xf32>
    %551 = vector.extract_strided_slice %548 {offsets = [0, 32], sizes = [8, 32], strides = [1, 1]} : vector<8x128xf32> to vector<8x32xf32>
    %552 = vector.extract_strided_slice %549 {offsets = [0, 64], sizes = [8, 32], strides = [1, 1]} : vector<8x128xf32> to vector<8x32xf32>
    %553 = vector.extract_strided_slice %548 {offsets = [0, 96], sizes = [8, 32], strides = [1, 1]} : vector<8x128xf32> to vector<8x32xf32>
    %554 = arith.mulf %551, %533 : vector<8x32xf32>
    %555 = arith.mulf %550, %552 : vector<8x32xf32>
    %556 = arith.addf %554, %555 : vector<8x32xf32>
    %557 = math.tanh %556 : vector<8x32xf32>
    %558 = arith.mulf %553, %557 : vector<8x32xf32>
    %559 = arith.index_cast %539 : i32 to index
    %c0_172 = arith.constant 0 : index
    %560 = vector.load %arg5[%559, %c0_172] : memref<64x32xf32, #tpu.memory_space<vmem>>, vector<8x32xf32>
    tpu.vector_store %arg5[%559, %c0_172], %558 {strides = array<i32>} : memref<64x32xf32, #tpu.memory_space<vmem>>, vector<8x32xf32>,
    %c7_i32_173 = arith.constant 7 : i32
    return
  }
  func.func @transform_0(%arg0: i32) -> (i32, i32) {
    %c0_i32 = arith.constant 0 : i32
    %c0_i32_0 = arith.constant 0 : i32
    %c0_i32_1 = arith.constant 0 : i32
    return %c0_i32, %c0_i32_0 : i32, i32
  }
  func.func @transform_1(%arg0: i32) -> (i32, i32, i32) {
    %c0_i32 = arith.constant 0 : i32
    %c0_i32_0 = arith.constant 0 : i32
    %c0_i32_1 = arith.constant 0 : i32
    %c0_i32_2 = arith.constant 0 : i32
    return %c0_i32, %c0_i32_0, %c0_i32_1 : i32, i32, i32
  }
  func.func @transform_2(%arg0: i32) -> (i32, i32, i32) {
    %c0_i32 = arith.constant 0 : i32
    %c0_i32_0 = arith.constant 0 : i32
    %c0_i32_1 = arith.constant 0 : i32
    %c0_i32_2 = arith.constant 0 : i32
    return %c0_i32, %c0_i32_0, %c0_i32_1 : i32, i32, i32
  }
  func.func @transform_3(%arg0: i32) -> (i32, i32, i32) {
    %c0_i32 = arith.constant 0 : i32
    %c0_i32_0 = arith.constant 0 : i32
    %c0_i32_1 = arith.constant 0 : i32
    %c0_i32_2 = arith.constant 0 : i32
    return %c0_i32, %c0_i32_0, %c0_i32_1 : i32, i32, i32
  }
  func.func @transform_4(%arg0: i32) -> (i32, i32) {
    %c0_i32 = arith.constant 0 : i32
    %c0_i32_0 = arith.constant 0 : i32
    %c0_i32_1 = arith.constant 0 : i32
    return %c0_i32, %c0_i32_0 : i32, i32
  }
}

</mosaic_0001>

<bundles_post_ra>
// kernel: ann_extension_forward.1
= control target key start
LH: loop header
LB: loop body
LE: loop exit
PB: predicated region body
PF: predicated region fallthrough
CT: control target
= control target key end

     0   :  { %9 = vsyncpa [#allocation4], 0  ;;  %s2173_s18 = smov [#allocation3]   ;;  %s2174_s20 = smov 128   ;;  %s2671_s0 = inlined_call_operand.vmem [shape: f32[64,32], index: 0, kind: input, shape index: {}]   ;;  %s2672_s1 = inlined_call_operand.vmem [shape: bf16[3,32,128], index: 1, kind: input, shape index: {}]   ;;  %s2673_s2 = inlined_call_operand.hbm [shape: f32[3,32,128], index: 2, kind: input, shape index: {}]   ;;  %s2674_s3 = inlined_call_operand.vmem [shape: f32[3,1,128], index: 3, kind: input, shape index: {}]   ;;  %s2675_s4 = inlined_call_operand.vmem [shape: f32[64,32], index: 4, kind: output, shape index: {}]  }
   0x1   :  { %s18_s17 = sshll.u32 %s2673_s2, 4  ;;  %s20_s19 = sshll.u32 %s2173_s18, 4  ;;  %s19_s17 = int_to_ptr.hbm [resolvable:$true] %s18_s17  ;;  %s21_s19 = int_to_ptr.vmem [resolvable:$true] %s20_s19 }
   0x2   :  { %s2175_s21 = smov 8  }
   0x3   :  { %26 = dma.hbm_to_vmem [thread:$0]  %s19_s17, 1536, %s21_s19, [#allocation4], %s2174_s20, %s2174_s20, %s2175_s21  }
   0x4   :  { %2171 = dma.done.wait [#allocation4], 1536  }
   0x5   :  { %2172 = vsyncadd [#allocation4], 4294965760  ;;  %v1937_v0 = vld [vmem:[%s2672_s1 + $0x8] sm:$0xff]  ;;  %v1936_v1 = vld [vmem:[%s2672_s1] sm:$0xff]  ;;  %vm70_vm0 = vcmask 261120   ;;  %s2176_s5 = smov 64  }
   0x6   :  { %v43_v2 = vld [vmem:[%s2671_s0] sm:$0xff]  ;;  %89 = vmatpush.bf16.msra.mxu0 %v1937_v0  ;;  %v44_v3 = vld [vmem:[%s2671_s0 + $0x8] sm:$0xff]  ;;  %s2177_s6 = smov 32   ;;  %s2178_s7 = smov 96   ;;  %v41_v25 = vld [vmem:[#allocation3 + $0x18] sm:$0xff] }
   0x7   :  { %v51_v4 = vpack.c.bf16 %v44_v3, %v43_v2  ;;  %v2223_v5 = vld [vmem:[%s2674_s3] ss:$0 sm:$0xff]  ;;  %v40_v26 = vld [vmem:[#allocation3 + $0x10] sm:$0xff]  ;;  %173 = vmatpush.msra.mxu3 %v41_v25  ;;  %245 = vmatpush.msra.mxu2 %v41_v25  ;;  %v39_v27 = vld [vmem:[#allocation3 + $0x8] sm:$0xff] }
   0x8   :  { %381 = vmatpush.msra.mxu1 %v41_v25  ;;  %v38_v28 = vld [vmem:[#allocation3] sm:$0xff]  ;;  %v45_v57 = vld [vmem:[%s2671_s0 + $0x10] sm:$0xff]  ;;  %v46_v58 = vld [vmem:[%s2671_s0 + $0x18] sm:$0xff] }
   0x9   :  { %174 = vmatpush.msra.mxu3 %v40_v26  ;;  %246 = vmatpush.msra.mxu2 %v40_v26  ;;  %v52_v59 = vpack.c.bf16 %v46_v58, %v45_v57 }
   0xa   :  { %90 = vmatpush.bf16.msra.mxu0 %v1936_v1  ;;  %382 = vmatpush.msra.mxu1 %v40_v26 }
   0xb   :  { %175 = vmatpush.msra.mxu3 %v39_v27  ;;  %247 = vmatpush.msra.mxu2 %v39_v27 }
   0xc   :  { %383 = vmatpush.msra.mxu1 %v39_v27 }
   0xd   :  { %1832 = vmatmul.msk.bf16.vlgmr.msra.gmra.mxu0 %vm70_vm0, %v51_v4  ;;  %176 = vmatpush.msra.mxu3 %v38_v28 }
   0xe   :  { %248 = vmatpush.msra.mxu2 %v38_v28  ;;  %384 = vmatpush.msra.mxu1 %v38_v28 }
   0xf   :  { %313 = vmatpush.msrb.mxu3 %v41_v25 }
  0x10   :  { %449 = vmatpush.msrb.mxu2 %v41_v25  ;;  %585 = vmatpush.msrb.mxu1 %v41_v25 }
  0x11   :  { %314 = vmatpush.msrb.mxu3 %v40_v26 }
  0x12   :  { %450 = vmatpush.msrb.mxu2 %v40_v26  ;;  %586 = vmatpush.msrb.mxu1 %v40_v26 }
  0x13   :  { %315 = vmatpush.msrb.mxu3 %v39_v27 }
  0x14   :  { %451 = vmatpush.msrb.mxu2 %v39_v27  ;;  %587 = vmatpush.msrb.mxu1 %v39_v27 }
  0x15   :  { %316 = vmatpush.msrb.mxu3 %v38_v28 }
  0x16   :  { %452 = vmatpush.msrb.mxu2 %v38_v28  ;;  %588 = vmatpush.msrb.mxu1 %v38_v28 }
  0x1d   :  { %1833 = vmatmul.msk.bf16.gmra.mxu0 %vm70_vm0, %v52_v59 }
  0x8a   :  { %v92_v6 = vpop.f32.mrf.mxu0 }
  0x8b   :  { %v93_v7 = vadd.f32 %v2223_v5, %v92_v6 }
  0x8d   :  { %1953 = vtanh.f32 %v93_v7  ;;  %v1836_v9 = vmul.f32 -1.442695, %v93_v7 }
  0x8f   :  { %1955 = vpow2.f32 %v1836_v9 }
  0x92   :  { %v94_v32 = vpop.f32.mrf.mxu0 }
  0x93   :  { %v1954_v8 = vpop.eup %1953  ;;  %v95_v33 = vadd.f32 %v2223_v5, %v94_v32 }
  0x94   :  { %142 = vrot.lane.b32.xlu0 %v1954_v8, %s2176_s5 }
  0x95   :  { %v1956_v10 = vpop.eup %1955 }
  0x96   :  { %v124_v11 = vadd.f32 1.0, %v1956_v10 }
  0x98   :  { %1957 = vrcp.f32 %v124_v11  ;;  %v136_v17 = vand.u32 2147483648, %v124_v11  ;;  %vm130_vm2 = vweird.f32 %v124_v11  ;;  %v134_v18 = vand.u32 2147483647, %v124_v11 }
  0x9a   :  { %v137_v20 = vor.u32 1.1754944e-38, %v136_v17  ;;  %vm135_vm4 = vcmp.eq.f32.partialorder %v134_v18, 8.507059e+37  ;;  %v97_v63 = vpop.f32.mrf.mxu0 }
  0x9b   :  { %v98_v0 = vadd.f32 %v2223_v5, %v97_v63 }
  0x9e   :  { %v1958_v12 = vpop.eup %1957 }
  0x9f   :  { %v126_v13 = vmul.f32 %v1958_v12, %v124_v11  ;;  %vm131_vm1 = vweird.f32 %v1958_v12 }
  0xa0   :  { %vm132_vm3 = vmor %vm130_vm2, %vm131_vm1 }
  0xa1   :  { %v127_v14 = vsub.f32 1.0, %v126_v13 }
  0xa3   :  { %v128_v15 = vmul.f32 %v1958_v12, %v127_v14 }
  0xa5   :  { %v129_v16 = vadd.f32 %v1958_v12, %v128_v15 }
  0xa7   :  { %v133_v19 = vsel %vm132_vm3, %v1958_v12, %v129_v16 }
  0xa8   :  { %v138_v22 = vsel %vm135_vm4, %v137_v20, %v133_v19 }
 0x106   :  { %v143_v21 = vpop.permute.xlu0 %142 }
 0x107   :  { %v145_v23 = vmul.f32 %v143_v21, %v138_v22 }
 0x109   :  { %1959 = vtanh.f32 %v145_v23  ;;  %203 = vrot.lane.b32.xlu2 %v145_v23, %s2177_s6 }
 0x10f   :  { %v1960_v24 = vpop.eup %1959 }
 0x110   :  { %148 = vrot.lane.b32.xlu0 %v1960_v24, %s2178_s7 }
 0x163   :  { %v204_v52 = vpop.permute.xlu2 %203 }
 0x182   :  { %v149_v29 = vpop.permute.xlu0 %148 }
 0x183   :  { %v151_v30 = vmul.f32 %v149_v29, %v138_v22 }
 0x185   :  { %153 = vrot.lane.b32.xlu1 %v151_v30, %s2177_s6 }
 0x1f7   :  { %v154_v31 = vpop.permute.xlu1 %153 }
 0x1f8   :  { %156 = vst.msk [vmem:[%s2675_s4] sm:$0xff] %vm70_vm0, %v154_v31  ;;  %1837 = vmatmul.msk.f32.vlgmr.msra.gmra.mxu3 %vm70_vm0, %v154_v31 }
 0x1f9   :  { %517 = vmatpush.msra.mxu3 %v41_v25 }
 0x1fb   :  { %518 = vmatpush.msra.mxu3 %v40_v26 }
 0x1fd   :  { %519 = vmatpush.msra.mxu3 %v39_v27  ;;  %v99_v27 = vpop.f32.mrf.mxu0 }
 0x1ff   :  { %520 = vmatpush.msra.mxu3 %v38_v28  ;;  %v100_v28 = vadd.f32 %v2223_v5, %v99_v27 }
 0x27b   :  { %v178_v34 = vpop.f32.mrf.mxu3 }
 0x27c   :  { %v181_v35 = vadd.f32 %v178_v34, %v95_v33 }
 0x27e   :  { %1961 = vtanh.f32 %v181_v35  ;;  %v1838_v37 = vmul.f32 -1.442695, %v181_v35 }
 0x280   :  { %1963 = vpow2.f32 %v1838_v37 }
 0x284   :  { %v1962_v36 = vpop.eup %1961 }
 0x285   :  { %208 = vrot.lane.b32.xlu1 %v1962_v36, %s2176_s5 }
 0x286   :  { %v1964_v38 = vpop.eup %1963 }
 0x287   :  { %v185_v39 = vadd.f32 1.0, %v1964_v38 }
 0x289   :  { %1965 = vrcp.f32 %v185_v39  ;;  %v197_v45 = vand.u32 2147483648, %v185_v39  ;;  %vm191_vm6 = vweird.f32 %v185_v39  ;;  %v195_v46 = vand.u32 2147483647, %v185_v39 }
 0x28b   :  { %v198_v48 = vor.u32 1.1754944e-38, %v197_v45  ;;  %vm196_vm8 = vcmp.eq.f32.partialorder %v195_v46, 8.507059e+37 }
 0x28f   :  { %v1966_v40 = vpop.eup %1965 }
 0x290   :  { %v187_v41 = vmul.f32 %v1966_v40, %v185_v39  ;;  %vm192_vm5 = vweird.f32 %v1966_v40 }
 0x291   :  { %vm193_vm7 = vmor %vm191_vm6, %vm192_vm5 }
 0x292   :  { %v188_v42 = vsub.f32 1.0, %v187_v41 }
 0x294   :  { %v189_v43 = vmul.f32 %v1966_v40, %v188_v42 }
 0x296   :  { %v190_v44 = vadd.f32 %v1966_v40, %v189_v43 }
 0x298   :  { %v194_v47 = vsel %vm193_vm7, %v1966_v40, %v190_v44 }
 0x299   :  { %v199_v50 = vsel %vm196_vm8, %v198_v48, %v194_v47 }
 0x29a   :  { %v206_v53 = vmul.f32 %v204_v52, %v199_v50  ;;  %v48_v52 = vld [vmem:[%s2671_s0 + $0x28] sm:$0xff] }
 0x2f7   :  { %v209_v49 = vpop.permute.xlu1 %208 }
 0x2f8   :  { %v211_v51 = vmul.f32 %v209_v49, %v199_v50 }
 0x2fa   :  { %213 = vrot.lane.b32.xlu2 %v211_v51, %s2177_s6  ;;  %v47_v51 = vld [vmem:[%s2671_s0 + $0x20] sm:$0xff] }
 0x354   :  { %v214_v54 = vpop.permute.xlu2 %213 }
 0x355   :  { %v216_v55 = vadd.f32 %v214_v54, %v206_v53  ;;  %v53_v53 = vpack.c.bf16 %v48_v52, %v47_v51 }
 0x357   :  { %1967 = vtanh.f32 %v216_v55  ;;  %1834 = vmatmul.msk.bf16.gmra.mxu0 %vm70_vm0, %v53_v53 }
 0x35d   :  { %v1968_v56 = vpop.eup %1967 }
 0x35e   :  { %219 = vrot.lane.b32.xlu0 %v1968_v56, %s2176_s5 }
 0x3d0   :  { %v220_v60 = vpop.permute.xlu0 %219 }
 0x3d1   :  { %v222_v61 = vmul.f32 %v220_v60, %v199_v50 }
 0x3d3   :  { %224 = vrot.lane.b32.xlu1 %v222_v61, %s2177_s6 }
 0x3d4   :  { %v102_v57 = vpop.f32.mrf.mxu0 }
 0x3d5   :  { %v103_v58 = vadd.f32 %v2223_v5, %v102_v57 }
 0x445   :  { %v225_v62 = vpop.permute.xlu1 %224 }
 0x446   :  { %1839 = vst.msk [vmem:[%s2675_s4 + $0x8] sm:$0xff] %vm70_vm0, %v225_v62  ;;  %1840 = vmatmul.msk.f32.vlgmr.msra.gmra.mxu2 %vm70_vm0, %v225_v62 }
 0x4c9   :  { %v250_v1 = vpop.f32.mrf.mxu2 }
 0x4ca   :  { %v253_v2 = vadd.f32 %v250_v1, %v98_v0 }
 0x4cc   :  { %1969 = vtanh.f32 %v253_v2  ;;  %v1841_v4 = vmul.f32 -1.442695, %v253_v2 }
 0x4ce   :  { %1971 = vpow2.f32 %v1841_v4 }
 0x4d2   :  { %v1970_v3 = vpop.eup %1969 }
 0x4d3   :  { %276 = vrot.lane.b32.xlu2 %v1970_v3, %s2176_s5 }
 0x4d4   :  { %v1972_v6 = vpop.eup %1971 }
 0x4d5   :  { %v257_v7 = vadd.f32 1.0, %v1972_v6 }
 0x4d7   :  { %1973 = vrcp.f32 %v257_v7  ;;  %v269_v13 = vand.u32 2147483648, %v257_v7  ;;  %vm263_vm10 = vweird.f32 %v257_v7  ;;  %v267_v14 = vand.u32 2147483647, %v257_v7 }
 0x4d9   :  { %v270_v16 = vor.u32 1.1754944e-38, %v269_v13  ;;  %vm268_vm12 = vcmp.eq.f32.partialorder %v267_v14, 8.507059e+37 }
 0x4dd   :  { %v1974_v8 = vpop.eup %1973 }
 0x4de   :  { %v259_v9 = vmul.f32 %v1974_v8, %v257_v7  ;;  %vm264_vm9 = vweird.f32 %v1974_v8 }
 0x4df   :  { %vm265_vm11 = vmor %vm263_vm10, %vm264_vm9 }
 0x4e0   :  { %v260_v10 = vsub.f32 1.0, %v259_v9 }
 0x4e2   :  { %v261_v11 = vmul.f32 %v1974_v8, %v260_v10 }
 0x4e4   :  { %v262_v12 = vadd.f32 %v1974_v8, %v261_v11 }
 0x4e6   :  { %v266_v15 = vsel %vm265_vm11, %v1974_v8, %v262_v12 }
 0x4e7   :  { %v271_v18 = vsel %vm268_vm12, %v270_v16, %v266_v15 }
 0x4e8   :  { %v274_v20 = vmul.f32 %v271_v18, %v216_v55 }
 0x52d   :  { %v277_v17 = vpop.permute.xlu2 %276 }
 0x52e   :  { %v279_v19 = vmul.f32 %v277_v17, %v271_v18 }
 0x530   :  { %281 = vrot.lane.b32.xlu0 %v279_v19, %s2177_s6 }
 0x5a2   :  { %v282_v21 = vpop.permute.xlu0 %281 }
 0x5a3   :  { %v284_v22 = vadd.f32 %v282_v21, %v274_v20  ;;  %v1939_v20 = vld [vmem:[%s2672_s1 + $0x18] sm:$0xff]  ;;  %v1938_v21 = vld [vmem:[%s2672_s1 + $0x10] sm:$0xff] }
 0x5a4   :  { %694 = vmatpush.bf16.msra.mxu2 %v1939_v20  ;;  %v2346_v20 = vld [vmem:[#allocation3 + $0x28] sm:$0xff] }
 0x5a5   :  { %1975 = vtanh.f32 %v284_v22 }
 0x5a8   :  { %695 = vmatpush.bf16.msra.mxu2 %v1938_v21  ;;  %v2351_v21 = vld [vmem:[#allocation3 + $0x20] sm:$0xff] }
 0x5ab   :  { %v1976_v23 = vpop.eup %1975 }
 0x5ac   :  { %287 = vrot.lane.b32.xlu1 %v1976_v23, %s2176_s5  ;;  %v650_v23 = vld [vmem:[%s2675_s4 + $0x8] sm:$0xff] }
 0x61e   :  { %v288_v24 = vpop.permute.xlu1 %287 }
 0x61f   :  { %v290_v25 = vmul.f32 %v288_v24, %v271_v18  ;;  %v649_v24 = vld [vmem:[%s2675_s4] sm:$0xff] }
 0x621   :  { %292 = vrot.lane.b32.xlu2 %v290_v25, %s2177_s6  ;;  %v657_v25 = vpack.c.bf16 %v650_v23, %v649_v24 }
 0x67b   :  { %v293_v26 = vpop.permute.xlu2 %292 }
 0x67c   :  { %1842 = vst.msk [vmem:[%s2675_s4 + $0x10] sm:$0xff] %vm70_vm0, %v293_v26  ;;  %1843 = vmatmul.msk.f32.vlgmr.msrb.gmra.mxu3 %vm70_vm0, %v293_v26 }
 0x683   :  { %v651_v27 = vld [vmem:[%s2675_s4 + $0x10] sm:$0xff] }
 0x6ff   :  { %v318_v29 = vpop.f32.mrf.mxu3 }
 0x700   :  { %v321_v30 = vadd.f32 %v318_v29, %v100_v28  ;;  %v104_v29 = vpop.f32.mrf.mxu0 }
 0x702   :  { %1977 = vtanh.f32 %v321_v30  ;;  %v1844_v32 = vmul.f32 -1.442695, %v321_v30  ;;  %v105_v30 = vadd.f32 %v2223_v5, %v104_v29 }
 0x704   :  { %1979 = vpow2.f32 %v1844_v32 }
 0x708   :  { %v1978_v31 = vpop.eup %1977 }
 0x709   :  { %344 = vrot.lane.b32.xlu0 %v1978_v31, %s2176_s5 }
 0x70a   :  { %v1980_v33 = vpop.eup %1979 }
 0x70b   :  { %v325_v34 = vadd.f32 1.0, %v1980_v33  ;;  %v2316_v33 = vld [vmem:[%s2674_s3 + $0x1] ss:$0 sm:$0xff] }
 0x70d   :  { %1981 = vrcp.f32 %v325_v34  ;;  %v337_v40 = vand.u32 2147483648, %v325_v34  ;;  %vm331_vm14 = vweird.f32 %v325_v34  ;;  %v335_v41 = vand.u32 2147483647, %v325_v34 }
 0x70f   :  { %v338_v43 = vor.u32 1.1754944e-38, %v337_v40  ;;  %vm336_vm1 = vcmp.eq.f32.partialorder %v335_v41, 8.507059e+37 }
 0x713   :  { %v1982_v35 = vpop.eup %1981 }
 0x714   :  { %v327_v36 = vmul.f32 %v1982_v35, %v325_v34  ;;  %vm332_vm13 = vweird.f32 %v1982_v35 }
 0x715   :  { %vm333_vm15 = vmor %vm331_vm14, %vm332_vm13 }
 0x716   :  { %v328_v37 = vsub.f32 1.0, %v327_v36 }
 0x718   :  { %v329_v38 = vmul.f32 %v1982_v35, %v328_v37 }
 0x71a   :  { %v330_v39 = vadd.f32 %v1982_v35, %v329_v38 }
 0x71c   :  { %v334_v42 = vsel %vm333_vm15, %v1982_v35, %v330_v39 }
 0x71d   :  { %v339_v45 = vsel %vm336_vm1, %v338_v43, %v334_v42 }
 0x71e   :  { %v342_v47 = vmul.f32 %v339_v45, %v284_v22 }
 0x77b   :  { %v345_v44 = vpop.permute.xlu0 %344 }
 0x77c   :  { %v347_v46 = vmul.f32 %v345_v44, %v339_v45 }
 0x77e   :  { %349 = vrot.lane.b32.xlu1 %v347_v46, %s2177_s6 }
 0x7f0   :  { %v350_v48 = vpop.permute.xlu1 %349 }
 0x7f1   :  { %v352_v49 = vadd.f32 %v350_v48, %v342_v47 }
 0x7f3   :  { %1983 = vtanh.f32 %v352_v49 }
 0x7f9   :  { %v1984_v50 = vpop.eup %1983 }
 0x7fa   :  { %355 = vrot.lane.b32.xlu2 %v1984_v50, %s2176_s5 }
 0x854   :  { %v356_v54 = vpop.permute.xlu2 %355 }
 0x855   :  { %v358_v55 = vmul.f32 %v356_v54, %v339_v45 }
 0x857   :  { %360 = vrot.lane.b32.xlu0 %v358_v55, %s2177_s6 }
 0x8c9   :  { %v361_v56 = vpop.permute.xlu0 %360 }
 0x8ca   :  { %1845 = vst.msk [vmem:[%s2675_s4 + $0x18] sm:$0xff] %vm70_vm0, %v361_v56  ;;  %1846 = vmatmul.msk.f32.vlgmr.msra.gmra.mxu1 %vm70_vm0, %v361_v56 }
 0x8d1   :  { %v652_v26 = vld [vmem:[%s2675_s4 + $0x18] sm:$0xff] }
 0x8d2   :  { %v658_v28 = vpack.c.bf16 %v652_v26, %v651_v27 }
 0x947   :  { %v386_v59 = vpop.f32.mrf.mxu1 }
 0x948   :  { %v389_v60 = vadd.f32 %v386_v59, %v103_v58 }
 0x94a   :  { %1985 = vtanh.f32 %v389_v60  ;;  %v1847_v62 = vmul.f32 -1.442695, %v389_v60 }
 0x94c   :  { %1987 = vpow2.f32 %v1847_v62 }
 0x950   :  { %v1986_v61 = vpop.eup %1985 }
 0x951   :  { %412 = vrot.lane.b32.xlu1 %v1986_v61, %s2176_s5 }
 0x952   :  { %v1988_v63 = vpop.eup %1987 }
 0x953   :  { %v393_v0 = vadd.f32 1.0, %v1988_v63 }
 0x955   :  { %1989 = vrcp.f32 %v393_v0  ;;  %v405_v7 = vand.u32 2147483648, %v393_v0  ;;  %vm399_vm3 = vweird.f32 %v393_v0  ;;  %v403_v8 = vand.u32 2147483647, %v393_v0 }
 0x957   :  { %v406_v10 = vor.u32 1.1754944e-38, %v405_v7  ;;  %vm404_vm5 = vcmp.eq.f32.partialorder %v403_v8, 8.507059e+37 }
 0x95b   :  { %v1990_v1 = vpop.eup %1989 }
 0x95c   :  { %v395_v2 = vmul.f32 %v1990_v1, %v393_v0  ;;  %vm400_vm2 = vweird.f32 %v1990_v1 }
 0x95d   :  { %vm401_vm4 = vmor %vm399_vm3, %vm400_vm2 }
 0x95e   :  { %v396_v3 = vsub.f32 1.0, %v395_v2 }
 0x960   :  { %v397_v4 = vmul.f32 %v1990_v1, %v396_v3 }
 0x962   :  { %v398_v6 = vadd.f32 %v1990_v1, %v397_v4 }
 0x964   :  { %v402_v9 = vsel %vm401_vm4, %v1990_v1, %v398_v6 }
 0x965   :  { %v407_v12 = vsel %vm404_vm5, %v406_v10, %v402_v9 }
 0x966   :  { %v410_v14 = vmul.f32 %v407_v12, %v352_v49 }
 0x9c3   :  { %v413_v11 = vpop.permute.xlu1 %412 }
 0x9c4   :  { %v415_v13 = vmul.f32 %v413_v11, %v407_v12 }
 0x9c6   :  { %417 = vrot.lane.b32.xlu2 %v415_v13, %s2177_s6 }
 0xa20   :  { %v418_v15 = vpop.permute.xlu2 %417 }
 0xa21   :  { %v2282_v16 = vadd.f32 %v418_v15, %v410_v14  ;;  %v2334_v15 = vld [vmem:[#allocation3 + $0x38] sm:$0xff] }
 0xa22   :  { %777 = vmatpush.msrb.mxu3 %v2334_v15  ;;  %847 = vmatpush.msra.mxu1 %v2334_v15 }
 0xa23   :  { %1991 = vtanh.f32 %v2282_v16 }
 0xa29   :  { %v1992_v17 = vpop.eup %1991 }
 0xa2a   :  { %423 = vrot.lane.b32.xlu0 %v1992_v17, %s2176_s5  ;;  %v49_v17 = vld [vmem:[%s2671_s0 + $0x30] sm:$0xff] }
 0xa9c   :  { %v424_v18 = vpop.permute.xlu0 %423 }
 0xa9d   :  { %v426_v19 = vmul.f32 %v424_v18, %v407_v12  ;;  %v50_v18 = vld [vmem:[%s2671_s0 + $0x38] sm:$0xff] }
 0xa9f   :  { %428 = vrot.lane.b32.xlu1 %v426_v19, %s2177_s6  ;;  %v54_v19 = vpack.c.bf16 %v50_v18, %v49_v17 }
 0xaa1   :  { %1835 = vmatmul.msk.bf16.gmra.mxu0 %vm70_vm0, %v54_v19 }
 0xb11   :  { %v429_v22 = vpop.permute.xlu1 %428 }
 0xb12   :  { %1848 = vst.msk [vmem:[%s2675_s4 + $0x20] sm:$0xff] %vm70_vm0, %v429_v22  ;;  %1849 = vmatmul.msk.f32.vlgmr.msrb.gmra.mxu2 %vm70_vm0, %v429_v22 }
 0xb19   :  { %v653_v23 = vld [vmem:[%s2675_s4 + $0x20] sm:$0xff] }
 0xb1a   :  { %1871 = vmatmul.msk.bf16.vlgmr.msra.gmra.mxu2 %vm70_vm0, %v657_v25 }
 0xb1e   :  { %v107_v26 = vpop.f32.mrf.mxu0 }
 0xb1f   :  { %v108_v27 = vadd.f32 %v2223_v5, %v107_v26 }
 0xb2a   :  { %1872 = vmatmul.msk.bf16.gmra.mxu2 %vm70_vm0, %v658_v28 }
 0xb95   :  { %v454_v31 = vpop.f32.mrf.mxu2 }
 0xb96   :  { %v457_v32 = vadd.f32 %v454_v31, %v105_v30 }
 0xb98   :  { %1993 = vtanh.f32 %v457_v32  ;;  %v1850_v38 = vmul.f32 -1.442695, %v457_v32 }
 0xb9d   :  { %v697_v34 = vpop.f32.mrf.mxu2 }
 0xb9e   :  { %v1994_v35 = vpop.eup %1993  ;;  %v698_v36 = vadd.f32 %v2316_v33, %v697_v34 }
 0xb9f   :  { %480 = vrot.lane.b32.xlu2 %v1994_v35, %s2176_s5 }
 0xba0   :  { %1995 = vtanh.f32 %v698_v36  ;;  %v1875_v44 = vmul.f32 -1.442695, %v698_v36 }
 0xba1   :  { %1997 = vpow2.f32 %v1850_v38 }
 0xba5   :  { %v699_v30 = vpop.f32.mrf.mxu2 }
 0xba6   :  { %v1996_v37 = vpop.eup %1995  ;;  %v700_v31 = vadd.f32 %v2316_v33, %v699_v30 }
 0xba7   :  { %747 = vrot.lane.b32.xlu1 %v1996_v37, %s2176_s5  ;;  %v1998_v39 = vpop.eup %1997 }
 0xba8   :  { %v461_v40 = vadd.f32 1.0, %v1998_v39 }
 0xbaa   :  { %1999 = vrcp.f32 %v461_v40  ;;  %v473_v47 = vand.u32 2147483648, %v461_v40  ;;  %vm467_vm7 = vweird.f32 %v461_v40  ;;  %v471_v48 = vand.u32 2147483647, %v461_v40 }
 0xbab   :  { %2001 = vpow2.f32 %v1875_v44 }
 0xbac   :  { %v474_v51 = vor.u32 1.1754944e-38, %v473_v47  ;;  %vm472_vm9 = vcmp.eq.f32.partialorder %v471_v48, 8.507059e+37 }
 0xbb0   :  { %v2000_v41 = vpop.eup %1999 }
 0xbb1   :  { %v463_v42 = vmul.f32 %v2000_v41, %v461_v40  ;;  %vm468_vm6 = vweird.f32 %v2000_v41  ;;  %v2002_v49 = vpop.eup %2001 }
 0xbb2   :  { %vm469_vm8 = vmor %vm467_vm7, %vm468_vm6  ;;  %v729_v52 = vadd.f32 1.0, %v2002_v49 }
 0xbb3   :  { %v464_v43 = vsub.f32 1.0, %v463_v42 }
 0xbb4   :  { %2003 = vrcp.f32 %v729_v52  ;;  %v741_v61 = vand.u32 2147483648, %v729_v52  ;;  %vm735_vm11 = vweird.f32 %v729_v52  ;;  %v739_v62 = vand.u32 2147483647, %v729_v52 }
 0xbb5   :  { %v465_v45 = vmul.f32 %v2000_v41, %v464_v43 }
 0xbb6   :  { %v742_v0 = vor.u32 1.1754944e-38, %v741_v61  ;;  %vm740_vm13 = vcmp.eq.f32.partialorder %v739_v62, 8.507059e+37 }
 0xbb7   :  { %v466_v46 = vadd.f32 %v2000_v41, %v465_v45 }
 0xbb9   :  { %v470_v50 = vsel %vm469_vm8, %v2000_v41, %v466_v46 }
 0xbba   :  { %v475_v54 = vsel %vm472_vm9, %v474_v51, %v470_v50  ;;  %v2004_v56 = vpop.eup %2003 }
 0xbbb   :  { %v731_v57 = vmul.f32 %v2004_v56, %v729_v52  ;;  %vm736_vm10 = vweird.f32 %v2004_v56  ;;  %v478_v6 = vmul.f32 %v475_v54, %v2282_v16  ;;  %v2336_v16 = vld [vmem:[#allocation3 + $0x30] sm:$0xff] }
 0xbbc   :  { %vm737_vm12 = vmor %vm735_vm11, %vm736_vm10  ;;  %778 = vmatpush.msrb.mxu3 %v2336_v16  ;;  %848 = vmatpush.msra.mxu1 %v2336_v16 }
 0xbbd   :  { %v732_v58 = vsub.f32 1.0, %v731_v57 }
 0xbbe   :  { %779 = vmatpush.msrb.mxu3 %v2346_v20  ;;  %849 = vmatpush.msra.mxu1 %v2346_v20 }
 0xbbf   :  { %v733_v59 = vmul.f32 %v2004_v56, %v732_v58 }
 0xbc0   :  { %780 = vmatpush.msrb.mxu3 %v2351_v21  ;;  %850 = vmatpush.msra.mxu1 %v2351_v21 }
 0xbc1   :  { %v734_v60 = vadd.f32 %v2004_v56, %v733_v59 }
 0xbc3   :  { %v738_v63 = vsel %vm737_vm12, %v2004_v56, %v734_v60 }
 0xbc4   :  { %v743_v2 = vsel %vm740_vm13, %v742_v0, %v738_v63 }
 0xbf9   :  { %v481_v53 = vpop.permute.xlu2 %480 }
 0xbfa   :  { %v483_v55 = vmul.f32 %v481_v53, %v475_v54 }
 0xbfc   :  { %485 = vrot.lane.b32.xlu0 %v483_v55, %s2177_s6 }
 0xc19   :  { %v748_v1 = vpop.permute.xlu1 %747 }
 0xc1a   :  { %v750_v3 = vmul.f32 %v748_v1, %v743_v2 }
 0xc1c   :  { %2005 = vtanh.f32 %v750_v3 }
 0xc22   :  { %v2006_v4 = vpop.eup %2005 }
 0xc23   :  { %753 = vrot.lane.b32.xlu0 %v2006_v4, %s2178_s7 }
 0xc6e   :  { %v486_v7 = vpop.permute.xlu0 %485 }
 0xc6f   :  { %v2324_v8 = vadd.f32 %v486_v7, %v478_v6 }
 0xc71   :  { %2007 = vtanh.f32 %v2324_v8 }
 0xc77   :  { %v2008_v9 = vpop.eup %2007 }
 0xc78   :  { %491 = vrot.lane.b32.xlu2 %v2008_v9, %s2176_s5 }
 0xc95   :  { %v754_v10 = vpop.permute.xlu0 %753 }
 0xc96   :  { %v756_v11 = vmul.f32 %v754_v10, %v743_v2 }
 0xc98   :  { %758 = vrot.lane.b32.xlu2 %v756_v11, %s2177_s6 }
 0xcd2   :  { %v492_v12 = vpop.permute.xlu2 %491 }
 0xcd3   :  { %v494_v13 = vmul.f32 %v492_v12, %v475_v54 }
 0xcd5   :  { %496 = vrot.lane.b32.xlu1 %v494_v13, %s2177_s6 }
 0xcf2   :  { %v759_v14 = vpop.permute.xlu2 %758 }
 0xcf3   :  { %761 = vst.msk [vmem:[%s2675_s4] sm:$0xff] %vm70_vm0, %v759_v14 }
 0xd47   :  { %v497_v22 = vpop.permute.xlu1 %496 }
 0xd48   :  { %1851 = vst.msk [vmem:[%s2675_s4 + $0x28] sm:$0xff] %vm70_vm0, %v497_v22  ;;  %1852 = vmatmul.msk.f32.vlgmr.msra.gmra.mxu3 %vm70_vm0, %v497_v22 }
 0xd49   :  { %913 = vmatpush.msra.mxu3 %v2334_v15 }
 0xd4b   :  { %914 = vmatpush.msra.mxu3 %v2336_v16 }
 0xd4d   :  { %915 = vmatpush.msra.mxu3 %v2346_v20 }
 0xd4f   :  { %v654_v24 = vld [vmem:[%s2675_s4 + $0x28] sm:$0xff]  ;;  %916 = vmatpush.msra.mxu3 %v2351_v21 }
 0xd50   :  { %1876 = vmatmul.msk.f32.vlgmr.msrb.gmra.mxu3 %vm70_vm0, %v759_v14  ;;  %v659_v25 = vpack.c.bf16 %v654_v24, %v653_v23  ;;  %v702_v23 = vpop.f32.mrf.mxu2 }
 0xd51   :  { %1045 = vmatpush.msrb.mxu3 %v2334_v15  ;;  %v703_v24 = vadd.f32 %v2316_v33, %v702_v23 }
 0xd52   :  { %1873 = vmatmul.msk.bf16.gmra.mxu2 %vm70_vm0, %v659_v25 }
 0xd53   :  { %1046 = vmatpush.msrb.mxu3 %v2336_v16 }
 0xd55   :  { %1047 = vmatpush.msrb.mxu3 %v2346_v20 }
 0xd57   :  { %1048 = vmatpush.msrb.mxu3 %v2351_v21 }
 0xdcb   :  { %v522_v28 = vpop.f32.mrf.mxu3 }
 0xdcc   :  { %v525_v29 = vadd.f32 %v522_v28, %v108_v27 }
 0xdce   :  { %2009 = vtanh.f32 %v525_v29  ;;  %v1853_v37 = vmul.f32 -1.442695, %v525_v29 }
 0xdd3   :  { %v782_v32 = vpop.f32.mrf.mxu3 }
 0xdd4   :  { %v2010_v34 = vpop.eup %2009  ;;  %v785_v35 = vadd.f32 %v782_v32, %v700_v31 }
 0xdd5   :  { %548 = vrot.lane.b32.xlu0 %v2010_v34, %s2176_s5 }
 0xdd6   :  { %2011 = vtanh.f32 %v785_v35  ;;  %v1877_v5 = vmul.f32 -1.442695, %v785_v35 }
 0xdd7   :  { %2013 = vpow2.f32 %v1853_v37 }
 0xdd8   :  { %2015 = vpow2.f32 %v1877_v5 }
 0xddc   :  { %v2012_v36 = vpop.eup %2011 }
 0xddd   :  { %807 = vrot.lane.b32.xlu0 %v750_v3, %s2177_s6  ;;  %812 = vrot.lane.b32.xlu1 %v2012_v36, %s2176_s5  ;;  %v2014_v38 = vpop.eup %2013 }
 0xdde   :  { %v529_v39 = vadd.f32 1.0, %v2014_v38  ;;  %v2016_v40 = vpop.eup %2015 }
 0xddf   :  { %v789_v41 = vadd.f32 1.0, %v2016_v40 }
 0xde0   :  { %2017 = vrcp.f32 %v529_v39  ;;  %v541_v50 = vand.u32 2147483648, %v529_v39  ;;  %vm535_vm15 = vweird.f32 %v529_v39  ;;  %v539_v51 = vand.u32 2147483647, %v529_v39 }
 0xde1   :  { %2019 = vrcp.f32 %v789_v41  ;;  %v801_v59 = vand.u32 2147483648, %v789_v41  ;;  %vm795_vm4 = vweird.f32 %v789_v41  ;;  %v799_v60 = vand.u32 2147483647, %v789_v41 }
 0xde2   :  { %v542_v54 = vor.u32 1.1754944e-38, %v541_v50  ;;  %vm540_vm2 = vcmp.eq.f32.partialorder %v539_v51, 8.507059e+37  ;;  %v704_v50 = vpop.f32.mrf.mxu2 }
 0xde3   :  { %v802_v62 = vor.u32 1.1754944e-38, %v801_v59  ;;  %vm800_vm6 = vcmp.eq.f32.partialorder %v799_v60, 8.507059e+37  ;;  %v705_v51 = vadd.f32 %v2316_v33, %v704_v50 }
 0xde6   :  { %v2018_v42 = vpop.eup %2017 }
 0xde7   :  { %v531_v43 = vmul.f32 %v2018_v42, %v529_v39  ;;  %v2020_v45 = vpop.eup %2019  ;;  %vm536_vm14 = vweird.f32 %v2018_v42 }
 0xde8   :  { %v791_v47 = vmul.f32 %v2020_v45, %v789_v41  ;;  %vm537_vm1 = vmor %vm535_vm15, %vm536_vm14  ;;  %vm796_vm3 = vweird.f32 %v2020_v45 }
 0xde9   :  { %v532_v44 = vsub.f32 1.0, %v531_v43  ;;  %vm797_vm5 = vmor %vm795_vm4, %vm796_vm3 }
 0xdea   :  { %v792_v49 = vsub.f32 1.0, %v791_v47 }
 0xdeb   :  { %v533_v46 = vmul.f32 %v2018_v42, %v532_v44 }
 0xdec   :  { %v793_v53 = vmul.f32 %v2020_v45, %v792_v49 }
 0xded   :  { %v534_v48 = vadd.f32 %v2018_v42, %v533_v46 }
 0xdee   :  { %v794_v58 = vadd.f32 %v2020_v45, %v793_v53 }
 0xdef   :  { %v538_v52 = vsel %vm537_vm1, %v2018_v42, %v534_v48 }
 0xdf0   :  { %v543_v55 = vsel %vm540_vm2, %v542_v54, %v538_v52  ;;  %v798_v61 = vsel %vm797_vm5, %v2020_v45, %v794_v58 }
 0xdf1   :  { %v803_v0 = vsel %vm800_vm6, %v802_v62, %v798_v61  ;;  %v546_v2 = vmul.f32 %v543_v55, %v2324_v8 }
 0xe47   :  { %v549_v56 = vpop.permute.xlu0 %548 }
 0xe48   :  { %v551_v57 = vmul.f32 %v549_v56, %v543_v55 }
 0xe4a   :  { %553 = vrot.lane.b32.xlu2 %v551_v57, %s2177_s6 }
 0xe4f   :  { %v813_v63 = vpop.permute.xlu1 %812  ;;  %v808_v7 = vpop.permute.xlu0 %807 }
 0xe50   :  { %v815_v1 = vmul.f32 %v813_v63, %v803_v0  ;;  %v810_v9 = vmul.f32 %v808_v7, %v803_v0 }
 0xe52   :  { %817 = vrot.lane.b32.xlu1 %v815_v1, %s2177_s6 }
 0xea4   :  { %v554_v3 = vpop.permute.xlu2 %553 }
 0xea5   :  { %v2386_v4 = vadd.f32 %v554_v3, %v546_v2 }
 0xea7   :  { %2021 = vtanh.f32 %v2386_v4 }
 0xead   :  { %v2022_v6 = vpop.eup %2021 }
 0xeae   :  { %559 = vrot.lane.b32.xlu2 %v2022_v6, %s2176_s5 }
 0xec4   :  { %v818_v10 = vpop.permute.xlu1 %817 }
 0xec5   :  { %v820_v11 = vadd.f32 %v818_v10, %v810_v9 }
 0xec7   :  { %2023 = vtanh.f32 %v820_v11 }
 0xecd   :  { %v2024_v12 = vpop.eup %2023 }
 0xece   :  { %823 = vrot.lane.b32.xlu0 %v2024_v12, %s2176_s5  ;;  %v707_v12 = vpop.f32.mrf.mxu2 }
 0xf08   :  { %v560_v13 = vpop.permute.xlu2 %559 }
 0xf09   :  { %v562_v14 = vmul.f32 %v560_v13, %v543_v55  ;;  %v708_v13 = vadd.f32 %v2316_v33, %v707_v12 }
 0xf0b   :  { %564 = vrot.lane.b32.xlu1 %v562_v14, %s2177_s6 }
 0xf40   :  { %v824_v8 = vpop.permute.xlu0 %823 }
 0xf41   :  { %v826_v17 = vmul.f32 %v824_v8, %v803_v0 }
 0xf43   :  { %828 = vrot.lane.b32.xlu2 %v826_v17, %s2177_s6 }
 0xf7d   :  { %v565_v18 = vpop.permute.xlu1 %564 }
 0xf7e   :  { %1854 = vst.msk [vmem:[%s2675_s4 + $0x30] sm:$0xff] %vm70_vm0, %v565_v18  ;;  %1855 = vmatmul.msk.f32.vlgmr.msrb.gmra.mxu1 %vm70_vm0, %v565_v18 }
 0xf7f   :  { %979 = vmatpush.msrb.mxu1 %v2334_v15 }
 0xf81   :  { %980 = vmatpush.msrb.mxu1 %v2336_v16 }
 0xf83   :  { %981 = vmatpush.msrb.mxu1 %v2346_v20 }
 0xf85   :  { %982 = vmatpush.msrb.mxu1 %v2351_v21 }
 0xf9d   :  { %v829_v19 = vpop.permute.xlu2 %828 }
 0xf9e   :  { %1878 = vst.msk [vmem:[%s2675_s4 + $0x8] sm:$0xff] %vm70_vm0, %v829_v19  ;;  %1879 = vmatmul.msk.f32.vlgmr.msra.gmra.mxu1 %vm70_vm0, %v829_v19 }
 0xf9f   :  { %1111 = vmatpush.msra.mxu1 %v2334_v15 }
 0xfa1   :  { %1112 = vmatpush.msra.mxu1 %v2336_v16 }
 0xfa3   :  { %1113 = vmatpush.msra.mxu1 %v2346_v20 }
 0xfa5   :  { %1114 = vmatpush.msra.mxu1 %v2351_v21 }
 0xffb   :  { %v2411_v22 = vpop.f32.mrf.mxu1 }
0x101b   :  { %v852_v25 = vpop.f32.mrf.mxu1 }
0x101c   :  { %v855_v26 = vadd.f32 %v852_v25, %v703_v24 }
0x101e   :  { %2025 = vtanh.f32 %v855_v26  ;;  %v1880_v28 = vmul.f32 -1.442695, %v855_v26 }
0x1020   :  { %2027 = vpow2.f32 %v1880_v28 }
0x1024   :  { %v2026_v27 = vpop.eup %2025 }
0x1025   :  { %878 = vrot.lane.b32.xlu0 %v2026_v27, %s2176_s5 }
0x1026   :  { %v2028_v29 = vpop.eup %2027 }
0x1027   :  { %v859_v30 = vadd.f32 1.0, %v2028_v29 }
0x1029   :  { %2029 = vrcp.f32 %v859_v30  ;;  %v871_v37 = vand.u32 2147483648, %v859_v30  ;;  %vm865_vm8 = vweird.f32 %v859_v30  ;;  %v869_v5 = vand.u32 2147483647, %v859_v30 }
0x102b   :  { %v872_v39 = vor.u32 1.1754944e-38, %v871_v37  ;;  %vm870_vm10 = vcmp.eq.f32.partialorder %v869_v5, 8.507059e+37 }
0x102f   :  { %v2030_v31 = vpop.eup %2029 }
0x1030   :  { %v861_v32 = vmul.f32 %v2030_v31, %v859_v30  ;;  %vm866_vm7 = vweird.f32 %v2030_v31  ;;  %v109_v30 = vpop.f32.mrf.mxu0 }
0x1031   :  { %vm867_vm9 = vmor %vm865_vm8, %vm866_vm7 }
0x1032   :  { %v862_v34 = vsub.f32 1.0, %v861_v32 }
0x1034   :  { %v863_v35 = vmul.f32 %v2030_v31, %v862_v34  ;;  %v2145_v34 = vld [vmem:[%s2674_s3] ss:$0 sm:$0xff] }
0x1036   :  { %v864_v36 = vadd.f32 %v2030_v31, %v863_v35  ;;  %v110_v35 = vadd.f32 %v2145_v34, %v109_v30 }
0x1038   :  { %v868_v38 = vsel %vm867_vm9, %v2030_v31, %v864_v36  ;;  %v593_v37 = vadd.f32 %v2411_v22, %v110_v35 }
0x1039   :  { %v873_v41 = vsel %vm870_vm10, %v872_v39, %v868_v38 }
0x103a   :  { %v876_v43 = vmul.f32 %v873_v41, %v820_v11 }
0x1097   :  { %v879_v40 = vpop.permute.xlu0 %878 }
0x1098   :  { %v881_v42 = vmul.f32 %v879_v40, %v873_v41 }
0x109a   :  { %883 = vrot.lane.b32.xlu1 %v881_v42, %s2177_s6 }
0x110c   :  { %v884_v44 = vpop.permute.xlu1 %883 }
0x110d   :  { %v886_v45 = vadd.f32 %v884_v44, %v876_v43 }
0x110f   :  { %2031 = vtanh.f32 %v886_v45 }
0x1115   :  { %v2032_v46 = vpop.eup %2031 }
0x1116   :  { %889 = vrot.lane.b32.xlu2 %v2032_v46, %s2176_s5 }
0x1170   :  { %v890_v47 = vpop.permute.xlu2 %889 }
0x1171   :  { %v892_v48 = vmul.f32 %v890_v47, %v873_v41 }
0x1173   :  { %894 = vrot.lane.b32.xlu0 %v892_v48, %s2177_s6 }
0x11e5   :  { %v895_v49 = vpop.permute.xlu0 %894 }
0x11e6   :  { %1881 = vst.msk [vmem:[%s2675_s4 + $0x10] sm:$0xff] %vm70_vm0, %v895_v49  ;;  %1882 = vmatmul.msk.f32.vlgmr.msra.gmra.mxu3 %vm70_vm0, %v895_v49 }
0x11e7   :  { %1177 = vmatpush.msra.mxu3 %v2334_v15 }
0x11e9   :  { %1178 = vmatpush.msra.mxu3 %v2336_v16 }
0x11eb   :  { %1179 = vmatpush.msra.mxu3 %v2346_v20 }
0x11ed   :  { %1180 = vmatpush.msra.mxu3 %v2351_v21 }
0x1269   :  { %v918_v52 = vpop.f32.mrf.mxu3 }
0x126a   :  { %v921_v53 = vadd.f32 %v918_v52, %v705_v51 }
0x126c   :  { %2033 = vtanh.f32 %v921_v53  ;;  %v1883_v55 = vmul.f32 -1.442695, %v921_v53 }
0x126e   :  { %2035 = vpow2.f32 %v1883_v55 }
0x1272   :  { %v2034_v54 = vpop.eup %2033 }
0x1273   :  { %944 = vrot.lane.b32.xlu1 %v2034_v54, %s2176_s5 }
0x1274   :  { %v2036_v56 = vpop.eup %2035 }
0x1275   :  { %v925_v57 = vadd.f32 1.0, %v2036_v56 }
0x1277   :  { %2037 = vrcp.f32 %v925_v57  ;;  %v937_v21 = vand.u32 2147483648, %v925_v57  ;;  %vm931_vm12 = vweird.f32 %v925_v57  ;;  %v935_v60 = vand.u32 2147483647, %v925_v57 }
0x1279   :  { %v938_v62 = vor.u32 1.1754944e-38, %v937_v21  ;;  %vm936_vm14 = vcmp.eq.f32.partialorder %v935_v60, 8.507059e+37 }
0x127d   :  { %v2038_v15 = vpop.eup %2037 }
0x127e   :  { %v927_v16 = vmul.f32 %v2038_v15, %v925_v57  ;;  %vm932_vm11 = vweird.f32 %v2038_v15 }
0x127f   :  { %vm933_vm13 = vmor %vm931_vm12, %vm932_vm11 }
0x1280   :  { %v928_v58 = vsub.f32 1.0, %v927_v16 }
0x1282   :  { %v929_v20 = vmul.f32 %v2038_v15, %v928_v58 }
0x1284   :  { %v930_v59 = vadd.f32 %v2038_v15, %v929_v20 }
0x1286   :  { %v934_v61 = vsel %vm933_vm13, %v2038_v15, %v930_v59  ;;  %v709_v59 = vpop.f32.mrf.mxu2 }
0x1287   :  { %v939_v0 = vsel %vm936_vm14, %v938_v62, %v934_v61  ;;  %v710_v21 = vadd.f32 %v2316_v33, %v709_v59 }
0x1288   :  { %v942_v2 = vmul.f32 %v939_v0, %v886_v45  ;;  %v1856_v45 = vmul.f32 -1.442695, %v593_v37 }
0x12e5   :  { %v945_v63 = vpop.permute.xlu1 %944 }
0x12e6   :  { %v947_v1 = vmul.f32 %v945_v63, %v939_v0 }
0x12e8   :  { %949 = vrot.lane.b32.xlu2 %v947_v1, %s2177_s6 }
0x1342   :  { %v950_v3 = vpop.permute.xlu2 %949 }
0x1343   :  { %v952_v6 = vadd.f32 %v950_v3, %v942_v2 }
0x1345   :  { %2039 = vtanh.f32 %v952_v6 }
0x134b   :  { %v2040_v7 = vpop.eup %2039 }
0x134c   :  { %955 = vrot.lane.b32.xlu0 %v2040_v7, %s2176_s5 }
0x13be   :  { %v956_v9 = vpop.permute.xlu0 %955 }
0x13bf   :  { %v958_v10 = vmul.f32 %v956_v9, %v939_v0 }
0x13c1   :  { %960 = vrot.lane.b32.xlu1 %v958_v10, %s2177_s6 }
0x1433   :  { %v961_v11 = vpop.permute.xlu1 %960 }
0x1434   :  { %1884 = vst.msk [vmem:[%s2675_s4 + $0x18] sm:$0xff] %vm70_vm0, %v961_v11  ;;  %1885 = vmatmul.msk.f32.vlgmr.msrb.gmra.mxu1 %vm70_vm0, %v961_v11 }
0x14b1   :  { %v984_v14 = vpop.f32.mrf.mxu1 }
0x14b2   :  { %v987_v8 = vadd.f32 %v984_v14, %v708_v13 }
0x14b4   :  { %2041 = vtanh.f32 %v987_v8  ;;  %v1886_v18 = vmul.f32 -1.442695, %v987_v8 }
0x14b6   :  { %2043 = vpow2.f32 %v1886_v18 }
0x14ba   :  { %v2042_v17 = vpop.eup %2041 }
0x14bb   :  { %1010 = vrot.lane.b32.xlu2 %v2042_v17, %s2176_s5 }
0x14bc   :  { %v2044_v19 = vpop.eup %2043 }
0x14bd   :  { %v991_v23 = vadd.f32 1.0, %v2044_v19 }
0x14bf   :  { %2045 = vrcp.f32 %v991_v23  ;;  %v1003_v29 = vand.u32 2147483648, %v991_v23  ;;  %vm997_vm1 = vweird.f32 %v991_v23  ;;  %v1001_v31 = vand.u32 2147483647, %v991_v23 }
0x14c0   :  { %2047 = vtanh.f32 %v593_v37  ;;  %v1941_v37 = vld [vmem:[%s2672_s1 + $0x28] sm:$0xff] }
0x14c1   :  { %v1004_v36 = vor.u32 1.1754944e-38, %v1003_v29  ;;  %vm1002_vm3 = vcmp.eq.f32.partialorder %v1001_v31, 8.507059e+37  ;;  %v655_v31 = vld [vmem:[%s2675_s4 + $0x30] sm:$0xff]  ;;  %1285 = vmatpush.bf16.msrb.mxu1 %v1941_v37  ;;  %1942 = vmatpush.bf16.msrb.mxu2 %v1941_v37  ;;  %v2544_v37 = vld [vmem:[#allocation3 + $0x40] sm:$0xff] }
0x14c5   :  { %v2046_v24 = vpop.eup %2045 }
0x14c6   :  { %v993_v25 = vmul.f32 %v2046_v24, %v991_v23  ;;  %vm998_vm15 = vweird.f32 %v2046_v24  ;;  %v2048_v40 = vpop.eup %2047 }
0x14c7   :  { %vm999_vm2 = vmor %vm997_vm1, %vm998_vm15 }
0x14c8   :  { %v994_v26 = vsub.f32 1.0, %v993_v25 }
0x14ca   :  { %v995_v27 = vmul.f32 %v2046_v24, %v994_v26 }
0x14cc   :  { %v996_v28 = vadd.f32 %v2046_v24, %v995_v27 }
0x14ce   :  { %v1000_v32 = vsel %vm999_vm2, %v2046_v24, %v996_v28 }
0x14cf   :  { %v1005_v38 = vsel %vm1002_vm3, %v1004_v36, %v1000_v32 }
0x14d0   :  { %v1008_v41 = vmul.f32 %v1005_v38, %v952_v6 }
0x1515   :  { %v1011_v5 = vpop.permute.xlu2 %1010 }
0x1516   :  { %v1013_v39 = vmul.f32 %v1011_v5, %v1005_v38  ;;  %v1940_v5 = vld [vmem:[%s2672_s1 + $0x20] sm:$0xff] }
0x1517   :  { %1286 = vmatpush.bf16.msrb.mxu1 %v1940_v5  ;;  %1943 = vmatpush.bf16.msrb.mxu2 %v1940_v5 }
0x1518   :  { %1015 = vrot.lane.b32.xlu0 %v1013_v39, %s2177_s6  ;;  %v1241_v39 = vld [vmem:[%s2675_s4 + $0x8] sm:$0xff] }
0x1520   :  { %616 = vrot.lane.b32.xlu0 %v2048_v40, %s2176_s5  ;;  %v1240_v40 = vld [vmem:[%s2675_s4] sm:$0xff] }
0x158a   :  { %v1016_v42 = vpop.permute.xlu0 %1015 }
0x158b   :  { %v2445_v43 = vadd.f32 %v1016_v42, %v1008_v41  ;;  %v1248_v41 = vpack.c.bf16 %v1241_v39, %v1240_v40  ;;  %v1243_v42 = vld [vmem:[%s2675_s4 + $0x18] sm:$0xff] }
0x158d   :  { %2049 = vtanh.f32 %v2445_v43 }
0x158e   :  { %2051 = vpow2.f32 %v1856_v45 }
0x1592   :  { %v617_v15 = vpop.permute.xlu0 %616 }
0x1593   :  { %v2050_v44 = vpop.eup %2049 }
0x1594   :  { %1021 = vrot.lane.b32.xlu1 %v2050_v44, %s2176_s5  ;;  %v2052_v22 = vpop.eup %2051 }
0x1595   :  { %v597_v46 = vadd.f32 1.0, %v2052_v22 }
0x1597   :  { %2053 = vrcp.f32 %v597_v46  ;;  %v609_v54 = vand.u32 2147483648, %v597_v46  ;;  %vm603_vm5 = vweird.f32 %v597_v46  ;;  %v607_v55 = vand.u32 2147483647, %v597_v46 }
0x1599   :  { %v610_v57 = vor.u32 1.1754944e-38, %v609_v54  ;;  %vm608_vm7 = vcmp.eq.f32.partialorder %v607_v55, 8.507059e+37 }
0x159d   :  { %v2054_v47 = vpop.eup %2053 }
0x159e   :  { %v599_v48 = vmul.f32 %v2054_v47, %v597_v46  ;;  %vm604_vm4 = vweird.f32 %v2054_v47 }
0x159f   :  { %vm605_vm6 = vmor %vm603_vm5, %vm604_vm4 }
0x15a0   :  { %v600_v49 = vsub.f32 1.0, %v599_v48 }
0x15a2   :  { %v601_v50 = vmul.f32 %v2054_v47, %v600_v49 }
0x15a4   :  { %v602_v52 = vadd.f32 %v2054_v47, %v601_v50 }
0x15a6   :  { %v606_v56 = vsel %vm605_vm6, %v2054_v47, %v602_v52 }
0x15a7   :  { %v611_v16 = vsel %vm608_vm7, %v610_v57, %v606_v56 }
0x15a8   :  { %v619_v58 = vmul.f32 %v617_v15, %v611_v16  ;;  %v614_v63 = vmul.f32 %v611_v16, %v2386_v4 }
0x1606   :  { %v1022_v51 = vpop.permute.xlu1 %1021 }
0x1607   :  { %v1024_v53 = vmul.f32 %v1022_v51, %v1005_v38  ;;  %v2515_v51 = vld [vmem:[%s2674_s3 + $0x2] ss:$0 sm:$0xff] }
0x1609   :  { %1026 = vrot.lane.b32.xlu2 %v1024_v53, %s2177_s6 }
0x1611   :  { %621 = vrot.lane.b32.xlu2 %v619_v58, %s2177_s6 }
0x1663   :  { %v1027_v20 = vpop.permute.xlu2 %1026 }
0x1664   :  { %1887 = vst.msk [vmem:[%s2675_s4 + $0x20] sm:$0xff] %vm70_vm0, %v1027_v20  ;;  %1888 = vmatmul.msk.f32.vlgmr.msrb.gmra.mxu3 %vm70_vm0, %v1027_v20 }
0x166b   :  { %v622_v62 = vpop.permute.xlu2 %621  ;;  %v1244_v22 = vld [vmem:[%s2675_s4 + $0x20] sm:$0xff] }
0x166c   :  { %v624_v0 = vadd.f32 %v622_v62, %v614_v63 }
0x16e7   :  { %v1050_v60 = vpop.f32.mrf.mxu3 }
0x16e8   :  { %v1053_v61 = vadd.f32 %v1050_v60, %v710_v21 }
0x16ea   :  { %2055 = vtanh.f32 %v1053_v61  ;;  %v1889_v3 = vmul.f32 -1.442695, %v1053_v61 }
0x16eb   :  { %2057 = vtanh.f32 %v624_v0 }
0x16ec   :  { %2059 = vpow2.f32 %v1889_v3 }
0x16f0   :  { %v2056_v1 = vpop.eup %2055 }
0x16f1   :  { %1076 = vrot.lane.b32.xlu1 %v2056_v1, %s2176_s5  ;;  %v2058_v2 = vpop.eup %2057 }
0x16f2   :  { %v2060_v6 = vpop.eup %2059 }
0x16f3   :  { %v1057_v7 = vadd.f32 1.0, %v2060_v6 }
0x16f5   :  { %2061 = vrcp.f32 %v1057_v7  ;;  %v1069_v4 = vand.u32 2147483648, %v1057_v7  ;;  %vm1063_vm9 = vweird.f32 %v1057_v7  ;;  %v1067_v14 = vand.u32 2147483647, %v1057_v7 }
0x16f7   :  { %v1070_v17 = vor.u32 1.1754944e-38, %v1069_v4  ;;  %vm1068_vm11 = vcmp.eq.f32.partialorder %v1067_v14, 8.507059e+37 }
0x16f9   :  { %627 = vrot.lane.b32.xlu1 %v2058_v2, %s2176_s5 }
0x16fb   :  { %v2062_v9 = vpop.eup %2061 }
0x16fc   :  { %v1059_v10 = vmul.f32 %v2062_v9, %v1057_v7  ;;  %vm1064_vm8 = vweird.f32 %v2062_v9 }
0x16fd   :  { %vm1065_vm10 = vmor %vm1063_vm9, %vm1064_vm8 }
0x16fe   :  { %v1060_v11 = vsub.f32 1.0, %v1059_v10 }
0x1700   :  { %v1061_v12 = vmul.f32 %v2062_v9, %v1060_v11 }
0x1702   :  { %v1062_v13 = vadd.f32 %v2062_v9, %v1061_v12 }
0x1704   :  { %v1066_v8 = vsel %vm1065_vm10, %v2062_v9, %v1062_v13 }
0x1705   :  { %v1071_v19 = vsel %vm1068_vm11, %v1070_v17, %v1066_v8 }
0x1706   :  { %v1074_v26 = vmul.f32 %v1071_v19, %v2445_v43  ;;  %v1242_v43 = vld [vmem:[%s2675_s4 + $0x10] sm:$0xff] }
0x1707   :  { %v1249_v44 = vpack.c.bf16 %v1243_v42, %v1242_v43 }
0x1763   :  { %v1077_v18 = vpop.permute.xlu1 %1076 }
0x1764   :  { %v1079_v23 = vmul.f32 %v1077_v18, %v1071_v19 }
0x1766   :  { %1081 = vrot.lane.b32.xlu0 %v1079_v23, %s2177_s6 }
0x176b   :  { %v628_v24 = vpop.permute.xlu1 %627 }
0x176c   :  { %v630_v25 = vmul.f32 %v628_v24, %v611_v16 }
0x176e   :  { %632 = vrot.lane.b32.xlu0 %v630_v25, %s2177_s6 }
0x17d8   :  { %v1082_v27 = vpop.permute.xlu0 %1081 }
0x17d9   :  { %v2463_v28 = vadd.f32 %v1082_v27, %v1074_v26 }
0x17db   :  { %2063 = vtanh.f32 %v2463_v28 }
0x17e0   :  { %v633_v29 = vpop.permute.xlu0 %632 }
0x17e1   :  { %v2064_v30 = vpop.eup %2063  ;;  %1857 = vst.msk [vmem:[%s2675_s4 + $0x38] sm:$0xff] %vm70_vm0, %v633_v29 }
0x17e2   :  { %1087 = vrot.lane.b32.xlu2 %v2064_v30, %s2176_s5 }
0x17e8   :  { %v656_v32 = vld [vmem:[%s2675_s4 + $0x38] sm:$0xff] }
0x17e9   :  { %v660_v34 = vpack.c.bf16 %v656_v32, %v655_v31 }
0x17eb   :  { %1874 = vmatmul.msk.bf16.gmra.mxu2 %vm70_vm0, %v660_v34 }
0x183c   :  { %v1088_v35 = vpop.permute.xlu2 %1087 }
0x183d   :  { %v1090_v36 = vmul.f32 %v1088_v35, %v1071_v19  ;;  %v2536_v35 = vld [vmem:[#allocation3 + $0x50] sm:$0xff] }
0x183f   :  { %1092 = vrot.lane.b32.xlu1 %v1090_v36, %s2177_s6  ;;  %v2540_v36 = vld [vmem:[#allocation3 + $0x48] sm:$0xff] }
0x186e   :  { %v712_v47 = vpop.f32.mrf.mxu2 }
0x186f   :  { %v713_v48 = vadd.f32 %v2316_v33, %v712_v47 }
0x18b1   :  { %v1093_v38 = vpop.permute.xlu1 %1092 }
0x18b2   :  { %1890 = vst.msk [vmem:[%s2675_s4 + $0x28] sm:$0xff] %vm70_vm0, %v1093_v38  ;;  %1891 = vmatmul.msk.f32.vlgmr.msra.gmra.mxu1 %vm70_vm0, %v1093_v38 }
0x18b9   :  { %v1245_v45 = vld [vmem:[%s2675_s4 + $0x28] sm:$0xff] }
0x18ba   :  { %1910 = vmatmul.msk.bf16.vlgmr.msrb.gmra.mxu1 %vm70_vm0, %v1248_v41  ;;  %v1250_v46 = vpack.c.bf16 %v1245_v45, %v1244_v22 }
0x18ca   :  { %1911 = vmatmul.msk.bf16.gmra.mxu1 %vm70_vm0, %v1249_v44 }
0x18da   :  { %1912 = vmatmul.msk.bf16.gmra.mxu1 %vm70_vm0, %v1250_v46 }
0x192f   :  { %v1116_v49 = vpop.f32.mrf.mxu1 }
0x1930   :  { %v1119_v50 = vadd.f32 %v1116_v49, %v713_v48 }
0x1932   :  { %2065 = vtanh.f32 %v1119_v50  ;;  %v1892_v56 = vmul.f32 -1.442695, %v1119_v50 }
0x1937   :  { %v1288_v52 = vpop.f32.mrf.mxu1 }
0x1938   :  { %v2066_v53 = vpop.eup %2065  ;;  %v1289_v54 = vadd.f32 %v2515_v51, %v1288_v52 }
0x1939   :  { %1142 = vrot.lane.b32.xlu2 %v2066_v53, %s2176_s5 }
0x193a   :  { %2067 = vtanh.f32 %v1289_v54  ;;  %v1914_v20 = vmul.f32 -1.442695, %v1289_v54 }
0x193b   :  { %2069 = vpow2.f32 %v1892_v56 }
0x193f   :  { %v1290_v39 = vpop.f32.mrf.mxu1 }
0x1940   :  { %v2068_v55 = vpop.eup %2067  ;;  %v1291_v40 = vadd.f32 %v2515_v51, %v1290_v39 }
0x1941   :  { %1338 = vrot.lane.b32.xlu1 %v2068_v55, %s2176_s5  ;;  %v2070_v33 = vpop.eup %2069 }
0x1942   :  { %v1123_v57 = vadd.f32 1.0, %v2070_v33 }
0x1944   :  { %2071 = vrcp.f32 %v1123_v57  ;;  %v1135_v60 = vand.u32 2147483648, %v1123_v57  ;;  %vm1129_vm13 = vweird.f32 %v1123_v57  ;;  %v1133_v61 = vand.u32 2147483647, %v1123_v57 }
0x1945   :  { %2073 = vpow2.f32 %v1914_v20 }
0x1946   :  { %v1136_v0 = vor.u32 1.1754944e-38, %v1135_v60  ;;  %vm1134_vm15 = vcmp.eq.f32.partialorder %v1133_v61, 8.507059e+37 }
0x194a   :  { %v2072_v15 = vpop.eup %2071 }
0x194b   :  { %v1125_v16 = vmul.f32 %v2072_v15, %v1123_v57  ;;  %vm1130_vm12 = vweird.f32 %v2072_v15  ;;  %v2074_v62 = vpop.eup %2073 }
0x194c   :  { %vm1131_vm14 = vmor %vm1129_vm13, %vm1130_vm12  ;;  %v1320_v1 = vadd.f32 1.0, %v2074_v62  ;;  %v1293_v62 = vpop.f32.mrf.mxu1 }
0x194d   :  { %v1126_v58 = vsub.f32 1.0, %v1125_v16 }
0x194e   :  { %2075 = vrcp.f32 %v1320_v1  ;;  %v1332_v13 = vand.u32 2147483648, %v1320_v1  ;;  %vm1326_vm2 = vweird.f32 %v1320_v1  ;;  %v1330_v4 = vand.u32 2147483647, %v1320_v1 }
0x194f   :  { %v1127_v59 = vmul.f32 %v2072_v15, %v1126_v58 }
0x1950   :  { %v1333_v8 = vor.u32 1.1754944e-38, %v1332_v13  ;;  %vm1331_vm4 = vcmp.eq.f32.partialorder %v1330_v4, 8.507059e+37 }
0x1951   :  { %v1128_v21 = vadd.f32 %v2072_v15, %v1127_v59 }
0x1953   :  { %v1132_v63 = vsel %vm1131_vm14, %v2072_v15, %v1128_v21 }
0x1954   :  { %v1137_v3 = vsel %vm1134_vm15, %v1136_v0, %v1132_v63  ;;  %v2076_v7 = vpop.eup %2075  ;;  %v1294_v63 = vadd.f32 %v2515_v51, %v1293_v62 }
0x1955   :  { %v1322_v9 = vmul.f32 %v2076_v7, %v1320_v1  ;;  %vm1327_vm1 = vweird.f32 %v2076_v7  ;;  %v1140_v24 = vmul.f32 %v1137_v3, %v2463_v28  ;;  %v2534_v28 = vld [vmem:[#allocation3 + $0x58] sm:$0xff] }
0x1956   :  { %vm1328_vm3 = vmor %vm1326_vm2, %vm1327_vm1  ;;  %1368 = vmatpush.msrb.mxu3 %v2534_v28  ;;  %1504 = vmatpush.msrb.mxu0 %v2534_v28 }
0x1957   :  { %v1323_v10 = vsub.f32 1.0, %v1322_v9 }
0x1958   :  { %1369 = vmatpush.msrb.mxu3 %v2536_v35  ;;  %1505 = vmatpush.msrb.mxu0 %v2536_v35 }
0x1959   :  { %v1324_v11 = vmul.f32 %v2076_v7, %v1323_v10 }
0x195a   :  { %1370 = vmatpush.msrb.mxu3 %v2540_v36  ;;  %1506 = vmatpush.msrb.mxu0 %v2540_v36 }
0x195b   :  { %v1325_v12 = vadd.f32 %v2076_v7, %v1324_v11 }
0x195c   :  { %1371 = vmatpush.msrb.mxu3 %v2544_v37  ;;  %1507 = vmatpush.msrb.mxu0 %v2544_v37 }
0x195d   :  { %v1329_v14 = vsel %vm1328_vm3, %v2076_v7, %v1325_v12 }
0x195e   :  { %v1334_v18 = vsel %vm1331_vm4, %v1333_v8, %v1329_v14  ;;  %1636 = vmatpush.msra.mxu0 %v2534_v28 }
0x1960   :  { %1637 = vmatpush.msra.mxu0 %v2536_v35 }
0x1962   :  { %1638 = vmatpush.msra.mxu0 %v2540_v36 }
0x1964   :  { %1639 = vmatpush.msra.mxu0 %v2544_v37 }
0x1993   :  { %v1143_v2 = vpop.permute.xlu2 %1142 }
0x1994   :  { %v1145_v6 = vmul.f32 %v1143_v2, %v1137_v3 }
0x1996   :  { %1147 = vrot.lane.b32.xlu0 %v1145_v6, %s2177_s6 }
0x19b3   :  { %v1339_v17 = vpop.permute.xlu1 %1338 }
0x19b4   :  { %v1341_v19 = vmul.f32 %v1339_v17, %v1334_v18 }
0x19b6   :  { %2077 = vtanh.f32 %v1341_v19 }
0x19bc   :  { %v2078_v23 = vpop.eup %2077 }
0x19bd   :  { %1344 = vrot.lane.b32.xlu0 %v2078_v23, %s2178_s7 }
0x1a08   :  { %v1148_v25 = vpop.permute.xlu0 %1147 }
0x1a09   :  { %v2523_v26 = vadd.f32 %v1148_v25, %v1140_v24 }
0x1a0b   :  { %2079 = vtanh.f32 %v2523_v26 }
0x1a11   :  { %v2080_v27 = vpop.eup %2079 }
0x1a12   :  { %1153 = vrot.lane.b32.xlu2 %v2080_v27, %s2176_s5 }
0x1a2f   :  { %v1345_v29 = vpop.permute.xlu0 %1344 }
0x1a30   :  { %v1347_v30 = vmul.f32 %v1345_v29, %v1334_v18 }
0x1a32   :  { %1349 = vrot.lane.b32.xlu2 %v1347_v30, %s2177_s6 }
0x1a6c   :  { %v1154_v31 = vpop.permute.xlu2 %1153 }
0x1a6d   :  { %v1156_v32 = vmul.f32 %v1154_v31, %v1137_v3 }
0x1a6f   :  { %1158 = vrot.lane.b32.xlu1 %v1156_v32, %s2177_s6 }
0x1a77   :  { %1398 = vrot.lane.b32.xlu1 %v1341_v19, %s2177_s6 }
0x1a8c   :  { %v1350_v34 = vpop.permute.xlu2 %1349 }
0x1a8d   :  { %1352 = vst.msk [vmem:[%s2675_s4] sm:$0xff] %vm70_vm0, %v1350_v34 }
0x1ae1   :  { %v1159_v5 = vpop.permute.xlu1 %1158 }
0x1ae2   :  { %1893 = vst.msk [vmem:[%s2675_s4 + $0x30] sm:$0xff] %vm70_vm0, %v1159_v5  ;;  %1894 = vmatmul.msk.f32.vlgmr.msra.gmra.mxu3 %vm70_vm0, %v1159_v5 }
0x1ae3   :  { %1438 = vmatpush.msra.mxu3 %v2534_v28 }
0x1ae5   :  { %1439 = vmatpush.msra.mxu3 %v2536_v35 }
0x1ae7   :  { %1440 = vmatpush.msra.mxu3 %v2540_v36 }
0x1ae9   :  { %1441 = vmatpush.msra.mxu3 %v2544_v37  ;;  %v1399_v15 = vpop.permute.xlu1 %1398 }
0x1aea   :  { %1915 = vmatmul.msk.f32.vlgmr.msrb.gmra.mxu3 %vm70_vm0, %v1350_v34  ;;  %v1295_v34 = vpop.f32.mrf.mxu1 }
0x1aeb   :  { %1570 = vmatpush.msrb.mxu3 %v2534_v28  ;;  %v1296_v5 = vadd.f32 %v2515_v51, %v1295_v34 }
0x1aed   :  { %1571 = vmatpush.msrb.mxu3 %v2536_v35 }
0x1aef   :  { %1572 = vmatpush.msrb.mxu3 %v2540_v36 }
0x1af1   :  { %1573 = vmatpush.msrb.mxu3 %v2544_v37 }
0x1b65   :  { %v2568_v38 = vpop.f32.mrf.mxu3 }
0x1b6d   :  { %v1373_v41 = vpop.f32.mrf.mxu3 }
0x1b6e   :  { %v1376_v42 = vadd.f32 %v1373_v41, %v1291_v40 }
0x1b70   :  { %2081 = vtanh.f32 %v1376_v42  ;;  %v1916_v44 = vmul.f32 -1.442695, %v1376_v42 }
0x1b72   :  { %2083 = vpow2.f32 %v1916_v44 }
0x1b76   :  { %v2082_v43 = vpop.eup %2081 }
0x1b77   :  { %1403 = vrot.lane.b32.xlu0 %v2082_v43, %s2176_s5 }
0x1b78   :  { %v2084_v45 = vpop.eup %2083 }
0x1b79   :  { %v1380_v22 = vadd.f32 1.0, %v2084_v45 }
0x1b7b   :  { %2085 = vrcp.f32 %v1380_v22  ;;  %v1392_v52 = vand.u32 2147483648, %v1380_v22  ;;  %vm1386_vm6 = vweird.f32 %v1380_v22  ;;  %v1390_v53 = vand.u32 2147483647, %v1380_v22 }
0x1b7d   :  { %v1393_v55 = vor.u32 1.1754944e-38, %v1392_v52  ;;  %vm1391_vm8 = vcmp.eq.f32.partialorder %v1390_v53, 8.507059e+37 }
0x1b81   :  { %v2086_v46 = vpop.eup %2085 }
0x1b82   :  { %v1382_v47 = vmul.f32 %v2086_v46, %v1380_v22  ;;  %vm1387_vm5 = vweird.f32 %v2086_v46 }
0x1b83   :  { %vm1388_vm7 = vmor %vm1386_vm6, %vm1387_vm5 }
0x1b84   :  { %v1383_v48 = vsub.f32 1.0, %v1382_v47 }
0x1b86   :  { %v1384_v49 = vmul.f32 %v2086_v46, %v1383_v48 }
0x1b88   :  { %v1385_v50 = vadd.f32 %v2086_v46, %v1384_v49 }
0x1b8a   :  { %v1389_v54 = vsel %vm1388_vm7, %v2086_v46, %v1385_v50 }
0x1b8b   :  { %v1394_v33 = vsel %vm1391_vm8, %v1393_v55, %v1389_v54 }
0x1b8c   :  { %v1401_v16 = vmul.f32 %v1399_v15, %v1394_v33 }
0x1be9   :  { %v1404_v56 = vpop.permute.xlu0 %1403 }
0x1bea   :  { %v1406_v57 = vmul.f32 %v1404_v56, %v1394_v33 }
0x1bec   :  { %1408 = vrot.lane.b32.xlu2 %v1406_v57, %s2177_s6 }
0x1c46   :  { %v1409_v58 = vpop.permute.xlu2 %1408 }
0x1c47   :  { %v1411_v20 = vadd.f32 %v1409_v58, %v1401_v16  ;;  %v1298_v16 = vpop.f32.mrf.mxu1 }
0x1c48   :  { %v1299_v58 = vadd.f32 %v2515_v51, %v1298_v16 }
0x1c49   :  { %2087 = vtanh.f32 %v1411_v20 }
0x1c4f   :  { %v2088_v59 = vpop.eup %2087 }
0x1c50   :  { %1414 = vrot.lane.b32.xlu0 %v2088_v59, %s2176_s5 }
0x1cc2   :  { %v1415_v21 = vpop.permute.xlu0 %1414 }
0x1cc3   :  { %v1417_v60 = vmul.f32 %v1415_v21, %v1394_v33 }
0x1cc5   :  { %1419 = vrot.lane.b32.xlu1 %v1417_v60, %s2177_s6 }
0x1d37   :  { %v1420_v61 = vpop.permute.xlu1 %1419 }
0x1d38   :  { %1917 = vst.msk [vmem:[%s2675_s4 + $0x8] sm:$0xff] %vm70_vm0, %v1420_v61  ;;  %1918 = vmatmul.msk.f32.vlgmr.msra.gmra.mxu3 %vm70_vm0, %v1420_v61 }
0x1d39   :  { %1702 = vmatpush.msra.mxu3 %v2534_v28 }
0x1d3b   :  { %1703 = vmatpush.msra.mxu3 %v2536_v35 }
0x1d3d   :  { %1704 = vmatpush.msra.mxu3 %v2540_v36 }
0x1d3f   :  { %1705 = vmatpush.msra.mxu3 %v2544_v37 }
0x1dbb   :  { %v1443_v0 = vpop.f32.mrf.mxu3 }
0x1dbc   :  { %v1446_v1 = vadd.f32 %v1443_v0, %v1294_v63 }
0x1dbe   :  { %2089 = vtanh.f32 %v1446_v1  ;;  %v1919_v3 = vmul.f32 -1.442695, %v1446_v1 }
0x1dc0   :  { %2091 = vpow2.f32 %v1919_v3 }
0x1dc4   :  { %v2090_v2 = vpop.eup %2089 }
0x1dc5   :  { %1469 = vrot.lane.b32.xlu2 %v2090_v2, %s2176_s5 }
0x1dc6   :  { %v2092_v6 = vpop.eup %2091 }
0x1dc7   :  { %v1450_v7 = vadd.f32 1.0, %v2092_v6 }
0x1dc9   :  { %2093 = vrcp.f32 %v1450_v7  ;;  %v1462_v4 = vand.u32 2147483648, %v1450_v7  ;;  %vm1456_vm10 = vweird.f32 %v1450_v7  ;;  %v1460_v14 = vand.u32 2147483647, %v1450_v7 }
0x1dcb   :  { %v1463_v17 = vor.u32 1.1754944e-38, %v1462_v4  ;;  %vm1461_vm12 = vcmp.eq.f32.partialorder %v1460_v14, 8.507059e+37 }
0x1dcf   :  { %v2094_v9 = vpop.eup %2093 }
0x1dd0   :  { %v1452_v10 = vmul.f32 %v2094_v9, %v1450_v7  ;;  %vm1457_vm9 = vweird.f32 %v2094_v9  ;;  %v714_v7 = vpop.f32.mrf.mxu2 }
0x1dd1   :  { %vm1458_vm11 = vmor %vm1456_vm10, %vm1457_vm9 }
0x1dd2   :  { %v1453_v11 = vsub.f32 1.0, %v1452_v10 }
0x1dd4   :  { %v1454_v12 = vmul.f32 %v2094_v9, %v1453_v11  ;;  %v2146_v11 = vld [vmem:[%s2674_s3 + $0x1] ss:$0 sm:$0xff] }
0x1dd6   :  { %v1455_v13 = vadd.f32 %v2094_v9, %v1454_v12  ;;  %v715_v12 = vadd.f32 %v2146_v11, %v714_v7 }
0x1dd8   :  { %v1459_v8 = vsel %vm1458_vm11, %v2094_v9, %v1455_v13  ;;  %v1185_v4 = vadd.f32 %v2568_v38, %v715_v12 }
0x1dd9   :  { %v1464_v19 = vsel %vm1461_vm12, %v1463_v17, %v1459_v8 }
0x1dda   :  { %v1467_v24 = vmul.f32 %v1464_v19, %v1411_v20 }
0x1e1f   :  { %v1470_v18 = vpop.permute.xlu2 %1469 }
0x1e20   :  { %v1472_v23 = vmul.f32 %v1470_v18, %v1464_v19 }
0x1e22   :  { %1474 = vrot.lane.b32.xlu0 %v1472_v23, %s2177_s6 }
0x1e94   :  { %v1475_v25 = vpop.permute.xlu0 %1474 }
0x1e95   :  { %v1477_v27 = vadd.f32 %v1475_v25, %v1467_v24 }
0x1e97   :  { %2095 = vtanh.f32 %v1477_v27 }
0x1e9d   :  { %v2096_v29 = vpop.eup %2095 }
0x1e9e   :  { %1480 = vrot.lane.b32.xlu1 %v2096_v29, %s2176_s5 }
0x1f10   :  { %v1481_v30 = vpop.permute.xlu1 %1480 }
0x1f11   :  { %v1483_v31 = vmul.f32 %v1481_v30, %v1464_v19 }
0x1f13   :  { %1485 = vrot.lane.b32.xlu2 %v1483_v31, %s2177_s6 }
0x1f6d   :  { %v1486_v32 = vpop.permute.xlu2 %1485 }
0x1f6e   :  { %1920 = vst.msk [vmem:[%s2675_s4 + $0x10] sm:$0xff] %vm70_vm0, %v1486_v32  ;;  %1921 = vmatmul.msk.f32.vlgmr.msrb.gmra.mxu0 %vm70_vm0, %v1486_v32 }
0x1f6f   :  { %1768 = vmatpush.msrb.mxu0 %v2534_v28 }
0x1f71   :  { %1769 = vmatpush.msrb.mxu0 %v2536_v35 }
0x1f73   :  { %1770 = vmatpush.msrb.mxu0 %v2540_v36 }
0x1f75   :  { %1771 = vmatpush.msrb.mxu0 %v2544_v37 }
0x1feb   :  { %v1509_v39 = vpop.f32.mrf.mxu0 }
0x1fec   :  { %v1512_v40 = vadd.f32 %v1509_v39, %v1296_v5 }
0x1fee   :  { %2097 = vtanh.f32 %v1512_v40  ;;  %v1922_v42 = vmul.f32 -1.442695, %v1512_v40 }
0x1ff0   :  { %2099 = vpow2.f32 %v1922_v42 }
0x1ff4   :  { %v2098_v41 = vpop.eup %2097 }
0x1ff5   :  { %1535 = vrot.lane.b32.xlu0 %v2098_v41, %s2176_s5 }
0x1ff6   :  { %v2100_v43 = vpop.eup %2099 }
0x1ff7   :  { %v1516_v44 = vadd.f32 1.0, %v2100_v43 }
0x1ff9   :  { %2101 = vrcp.f32 %v1516_v44  ;;  %v1528_v37 = vand.u32 2147483648, %v1516_v44  ;;  %vm1522_vm14 = vweird.f32 %v1516_v44  ;;  %v1526_v46 = vand.u32 2147483647, %v1516_v44 }
0x1ffb   :  { %v1529_v48 = vor.u32 1.1754944e-38, %v1528_v37  ;;  %vm1527_vm1 = vcmp.eq.f32.partialorder %v1526_v46, 8.507059e+37 }
0x1fff   :  { %v2102_v28 = vpop.eup %2101 }
0x2000   :  { %v1518_v35 = vmul.f32 %v2102_v28, %v1516_v44  ;;  %vm1523_vm13 = vweird.f32 %v2102_v28 }
0x2001   :  { %vm1524_vm15 = vmor %vm1522_vm14, %vm1523_vm13 }
0x2002   :  { %v1519_v45 = vsub.f32 1.0, %v1518_v35 }
0x2004   :  { %v1520_v36 = vmul.f32 %v2102_v28, %v1519_v45 }
0x2006   :  { %v1521_v22 = vadd.f32 %v2102_v28, %v1520_v36 }
0x2008   :  { %v1525_v47 = vsel %vm1524_vm15, %v2102_v28, %v1521_v22  ;;  %v1300_v22 = vpop.f32.mrf.mxu1 }
0x2009   :  { %v1530_v50 = vsel %vm1527_vm1, %v1529_v48, %v1525_v47  ;;  %v1301_v37 = vadd.f32 %v2515_v51, %v1300_v22 }
0x200a   :  { %v1533_v53 = vmul.f32 %v1530_v50, %v1477_v27  ;;  %v1895_v27 = vmul.f32 -1.442695, %v1185_v4 }
0x2067   :  { %v1536_v49 = vpop.permute.xlu0 %1535 }
0x2068   :  { %v1538_v52 = vmul.f32 %v1536_v49, %v1530_v50 }
0x206a   :  { %1540 = vrot.lane.b32.xlu1 %v1538_v52, %s2177_s6 }
0x20dc   :  { %v1541_v54 = vpop.permute.xlu1 %1540 }
0x20dd   :  { %v1543_v55 = vadd.f32 %v1541_v54, %v1533_v53 }
0x20df   :  { %2103 = vtanh.f32 %v1543_v55 }
0x20e5   :  { %v2104_v56 = vpop.eup %2103 }
0x20e6   :  { %1546 = vrot.lane.b32.xlu2 %v2104_v56, %s2176_s5 }
0x2140   :  { %v1547_v33 = vpop.permute.xlu2 %1546 }
0x2141   :  { %v1549_v57 = vmul.f32 %v1547_v33, %v1530_v50 }
0x2143   :  { %1551 = vrot.lane.b32.xlu0 %v1549_v57, %s2177_s6 }
0x21b5   :  { %v1552_v15 = vpop.permute.xlu0 %1551 }
0x21b6   :  { %1923 = vst.msk [vmem:[%s2675_s4 + $0x18] sm:$0xff] %vm70_vm0, %v1552_v15  ;;  %1924 = vmatmul.msk.f32.vlgmr.msrb.gmra.mxu3 %vm70_vm0, %v1552_v15 }
0x2239   :  { %v1575_v20 = vpop.f32.mrf.mxu3 }
0x223a   :  { %v1578_v59 = vadd.f32 %v1575_v20, %v1299_v58 }
0x223c   :  { %2105 = vtanh.f32 %v1578_v59  ;;  %v1925_v60 = vmul.f32 -1.442695, %v1578_v59 }
0x223e   :  { %2107 = vpow2.f32 %v1925_v60 }
0x2242   :  { %v2106_v21 = vpop.eup %2105 }
0x2243   :  { %1601 = vrot.lane.b32.xlu1 %v2106_v21, %s2176_s5 }
0x2244   :  { %v2108_v61 = vpop.eup %2107 }
0x2245   :  { %v1582_v62 = vadd.f32 1.0, %v2108_v61 }
0x2247   :  { %2109 = vrcp.f32 %v1582_v62  ;;  %v1594_v6 = vand.u32 2147483648, %v1582_v62  ;;  %vm1588_vm3 = vweird.f32 %v1582_v62  ;;  %v1592_v9 = vand.u32 2147483647, %v1582_v62 }
0x2248   :  { %2111 = vtanh.f32 %v1185_v4 }
0x2249   :  { %v1595_v13 = vor.u32 1.1754944e-38, %v1594_v6  ;;  %vm1593_vm5 = vcmp.eq.f32.partialorder %v1592_v9, 8.507059e+37  ;;  %v1246_v9 = vld [vmem:[%s2675_s4 + $0x30] sm:$0xff] }
0x224d   :  { %v2110_v63 = vpop.eup %2109 }
0x224e   :  { %v1584_v0 = vmul.f32 %v2110_v63, %v1582_v62  ;;  %vm1589_vm2 = vweird.f32 %v2110_v63  ;;  %v2112_v18 = vpop.eup %2111 }
0x224f   :  { %vm1590_vm4 = vmor %vm1588_vm3, %vm1589_vm2 }
0x2250   :  { %v1585_v1 = vsub.f32 1.0, %v1584_v0 }
0x2252   :  { %v1586_v2 = vmul.f32 %v2110_v63, %v1585_v1 }
0x2254   :  { %v1587_v3 = vadd.f32 %v2110_v63, %v1586_v2 }
0x2256   :  { %v1591_v10 = vsel %vm1590_vm4, %v2110_v63, %v1587_v3 }
0x2257   :  { %v1596_v8 = vsel %vm1593_vm5, %v1595_v13, %v1591_v10 }
0x2258   :  { %v1599_v19 = vmul.f32 %v1596_v8, %v1543_v55 }
0x22b5   :  { %v1602_v14 = vpop.permute.xlu1 %1601 }
0x22b6   :  { %v1604_v17 = vmul.f32 %v1602_v14, %v1596_v8 }
0x22b8   :  { %1606 = vrot.lane.b32.xlu2 %v1604_v17, %s2177_s6 }
0x22c0   :  { %1208 = vrot.lane.b32.xlu2 %v2112_v18, %s2176_s5 }
0x2312   :  { %v1607_v23 = vpop.permute.xlu2 %1606 }
0x2313   :  { %v2616_v24 = vadd.f32 %v1607_v23, %v1599_v19 }
0x2315   :  { %2113 = vtanh.f32 %v2616_v24 }
0x2316   :  { %2115 = vpow2.f32 %v1895_v27 }
0x231a   :  { %v1209_v28 = vpop.permute.xlu2 %1208 }
0x231b   :  { %v2114_v25 = vpop.eup %2113 }
0x231c   :  { %1612 = vrot.lane.b32.xlu0 %v2114_v25, %s2176_s5  ;;  %v2116_v38 = vpop.eup %2115 }
0x231d   :  { %v1189_v29 = vadd.f32 1.0, %v2116_v38 }
0x231f   :  { %2117 = vrcp.f32 %v1189_v29  ;;  %v1201_v41 = vand.u32 2147483648, %v1189_v29  ;;  %vm1195_vm7 = vweird.f32 %v1189_v29  ;;  %v1199_v42 = vand.u32 2147483647, %v1189_v29 }
0x2321   :  { %v1202_v44 = vor.u32 1.1754944e-38, %v1201_v41  ;;  %vm1200_vm9 = vcmp.eq.f32.partialorder %v1199_v42, 8.507059e+37 }
0x2325   :  { %v2118_v30 = vpop.eup %2117 }
0x2326   :  { %v1191_v31 = vmul.f32 %v2118_v30, %v1189_v29  ;;  %vm1196_vm6 = vweird.f32 %v2118_v30 }
0x2327   :  { %vm1197_vm8 = vmor %vm1195_vm7, %vm1196_vm6 }
0x2328   :  { %v1192_v32 = vsub.f32 1.0, %v1191_v31 }
0x232a   :  { %v1193_v34 = vmul.f32 %v2118_v30, %v1192_v32 }
0x232c   :  { %v1194_v39 = vadd.f32 %v2118_v30, %v1193_v34 }
0x232e   :  { %v1198_v43 = vsel %vm1197_vm8, %v2118_v30, %v1194_v39 }
0x232f   :  { %v1203_v35 = vsel %vm1200_vm9, %v1202_v44, %v1198_v43 }
0x2330   :  { %v1211_v45 = vmul.f32 %v1209_v28, %v1203_v35  ;;  %v1206_v49 = vmul.f32 %v1203_v35, %v2523_v26 }
0x238e   :  { %v1613_v5 = vpop.permute.xlu0 %1612 }
0x238f   :  { %v1615_v40 = vmul.f32 %v1613_v5, %v1596_v8 }
0x2391   :  { %1617 = vrot.lane.b32.xlu1 %v1615_v40, %s2177_s6 }
0x2399   :  { %1213 = vrot.lane.b32.xlu1 %v1211_v45, %s2177_s6 }
0x2403   :  { %v1618_v36 = vpop.permute.xlu1 %1617 }
0x2404   :  { %1926 = vst.msk [vmem:[%s2675_s4 + $0x20] sm:$0xff] %vm70_vm0, %v1618_v36  ;;  %1927 = vmatmul.msk.f32.vlgmr.msra.gmra.mxu0 %vm70_vm0, %v1618_v36 }
0x240b   :  { %v1214_v48 = vpop.permute.xlu1 %1213 }
0x240c   :  { %v1216_v50 = vadd.f32 %v1214_v48, %v1206_v49 }
0x2481   :  { %v1641_v46 = vpop.f32.mrf.mxu0 }
0x2482   :  { %v1644_v47 = vadd.f32 %v1641_v46, %v1301_v37 }
0x2484   :  { %2119 = vtanh.f32 %v1644_v47  ;;  %v1928_v54 = vmul.f32 -1.442695, %v1644_v47 }
0x2485   :  { %2121 = vtanh.f32 %v1216_v50 }
0x2486   :  { %2123 = vpow2.f32 %v1928_v54 }
0x248a   :  { %v2120_v52 = vpop.eup %2119 }
0x248b   :  { %1667 = vrot.lane.b32.xlu0 %v2120_v52, %s2176_s5  ;;  %v2122_v53 = vpop.eup %2121 }
0x248c   :  { %v2124_v55 = vpop.eup %2123 }
0x248d   :  { %v1648_v56 = vadd.f32 1.0, %v2124_v55 }
0x248f   :  { %2125 = vrcp.f32 %v1648_v56  ;;  %v1660_v26 = vand.u32 2147483648, %v1648_v56  ;;  %vm1654_vm11 = vweird.f32 %v1648_v56  ;;  %v1658_v20 = vand.u32 2147483647, %v1648_v56 }
0x2491   :  { %v1661_v21 = vor.u32 1.1754944e-38, %v1660_v26  ;;  %vm1659_vm13 = vcmp.eq.f32.partialorder %v1658_v20, 8.507059e+37 }
0x2493   :  { %1219 = vrot.lane.b32.xlu0 %v2122_v53, %s2176_s5 }
0x2495   :  { %v2126_v33 = vpop.eup %2125 }
0x2496   :  { %v1650_v57 = vmul.f32 %v2126_v33, %v1648_v56  ;;  %vm1655_vm10 = vweird.f32 %v2126_v33 }
0x2497   :  { %vm1656_vm12 = vmor %vm1654_vm11, %vm1655_vm10 }
0x2498   :  { %v1651_v15 = vsub.f32 1.0, %v1650_v57 }
0x249a   :  { %v1652_v16 = vmul.f32 %v2126_v33, %v1651_v15 }
0x249c   :  { %v1653_v58 = vadd.f32 %v2126_v33, %v1652_v16 }
0x249e   :  { %v1657_v59 = vsel %vm1656_vm12, %v2126_v33, %v1653_v58 }
0x249f   :  { %v1662_v61 = vsel %vm1659_vm13, %v1661_v21, %v1657_v59 }
0x24a0   :  { %v1665_v1 = vmul.f32 %v1662_v61, %v2616_v24 }
0x24fd   :  { %v1668_v60 = vpop.permute.xlu0 %1667 }
0x24fe   :  { %v1670_v62 = vmul.f32 %v1668_v60, %v1662_v61 }
0x2500   :  { %1672 = vrot.lane.b32.xlu2 %v1670_v62, %s2177_s6 }
0x2505   :  { %v1220_v63 = vpop.permute.xlu0 %1219 }
0x2506   :  { %v1222_v0 = vmul.f32 %v1220_v63, %v1203_v35 }
0x2508   :  { %1224 = vrot.lane.b32.xlu2 %v1222_v0, %s2177_s6 }
0x255a   :  { %v1673_v2 = vpop.permute.xlu2 %1672 }
0x255b   :  { %v1675_v3 = vadd.f32 %v1673_v2, %v1665_v1 }
0x255d   :  { %2127 = vtanh.f32 %v1675_v3 }
0x2562   :  { %v1225_v6 = vpop.permute.xlu2 %1224 }
0x2563   :  { %v2128_v7 = vpop.eup %2127  ;;  %1896 = vst.msk [vmem:[%s2675_s4 + $0x38] sm:$0xff] %vm70_vm0, %v1225_v6 }
0x2564   :  { %1678 = vrot.lane.b32.xlu1 %v2128_v7, %s2176_s5 }
0x256a   :  { %v1247_v10 = vld [vmem:[%s2675_s4 + $0x38] sm:$0xff] }
0x256b   :  { %v1251_v11 = vpack.c.bf16 %v1247_v10, %v1246_v9 }
0x256d   :  { %1913 = vmatmul.msk.bf16.vlgmr.msrb.gmra.mxu2 %vm70_vm0, %v1251_v11 }
0x25d6   :  { %v1679_v12 = vpop.permute.xlu1 %1678 }
0x25d7   :  { %v1681_v13 = vmul.f32 %v1679_v12, %v1662_v61 }
0x25d9   :  { %1683 = vrot.lane.b32.xlu0 %v1681_v13, %s2177_s6 }
0x25f0   :  { %v1303_v14 = vpop.f32.mrf.mxu2 }
0x25f1   :  { %v1304_v8 = vadd.f32 %v2515_v51, %v1303_v14 }
0x25f8   :  { %v1305_v37 = vpop.f32.mrf.mxu2 }
0x25f9   :  { %v1306_v46 = vadd.f32 %v2515_v51, %v1305_v37 }
0x264b   :  { %v1684_v4 = vpop.permute.xlu0 %1683 }
0x264c   :  { %1929 = vst.msk [vmem:[%s2675_s4 + $0x28] sm:$0xff] %vm70_vm0, %v1684_v4  ;;  %1930 = vmatmul.msk.f32.vlgmr.msra.gmra.mxu3 %vm70_vm0, %v1684_v4 }
0x26cf   :  { %v1707_v17 = vpop.f32.mrf.mxu3 }
0x26d0   :  { %v1710_v18 = vadd.f32 %v1707_v17, %v1304_v8 }
0x26d2   :  { %2129 = vtanh.f32 %v1710_v18  ;;  %v1931_v23 = vmul.f32 -1.442695, %v1710_v18 }
0x26d4   :  { %2131 = vpow2.f32 %v1931_v23 }
0x26d8   :  { %v2130_v19 = vpop.eup %2129 }
0x26d9   :  { %1733 = vrot.lane.b32.xlu1 %v2130_v19, %s2176_s5 }
0x26da   :  { %v2132_v24 = vpop.eup %2131 }
0x26db   :  { %v1714_v25 = vadd.f32 1.0, %v2132_v24 }
0x26dd   :  { %2133 = vrcp.f32 %v1714_v25  ;;  %v1726_v32 = vand.u32 2147483648, %v1714_v25  ;;  %vm1720_vm15 = vweird.f32 %v1714_v25  ;;  %v1724_v34 = vand.u32 2147483647, %v1714_v25 }
0x26df   :  { %v1727_v39 = vor.u32 1.1754944e-38, %v1726_v32  ;;  %vm1725_vm2 = vcmp.eq.f32.partialorder %v1724_v34, 8.507059e+37 }
0x26e3   :  { %v2134_v27 = vpop.eup %2133 }
0x26e4   :  { %v1716_v38 = vmul.f32 %v2134_v27, %v1714_v25  ;;  %vm1721_vm14 = vweird.f32 %v2134_v27 }
0x26e5   :  { %vm1722_vm1 = vmor %vm1720_vm15, %vm1721_vm14 }
0x26e6   :  { %v1717_v29 = vsub.f32 1.0, %v1716_v38 }
0x26e8   :  { %v1718_v30 = vmul.f32 %v2134_v27, %v1717_v29 }
0x26ea   :  { %v1719_v31 = vadd.f32 %v2134_v27, %v1718_v30 }
0x26ec   :  { %v1723_v5 = vsel %vm1722_vm1, %v2134_v27, %v1719_v31 }
0x26ed   :  { %v1728_v41 = vsel %vm1725_vm2, %v1727_v39, %v1723_v5 }
0x26ee   :  { %v1731_v43 = vmul.f32 %v1728_v41, %v1675_v3 }
0x274b   :  { %v1734_v40 = vpop.permute.xlu1 %1733 }
0x274c   :  { %v1736_v42 = vmul.f32 %v1734_v40, %v1728_v41 }
0x274e   :  { %1738 = vrot.lane.b32.xlu2 %v1736_v42, %s2177_s6 }
0x27a8   :  { %v1739_v44 = vpop.permute.xlu2 %1738 }
0x27a9   :  { %v1741_v28 = vadd.f32 %v1739_v44, %v1731_v43 }
0x27ab   :  { %2135 = vtanh.f32 %v1741_v28 }
0x27b1   :  { %v2136_v35 = vpop.eup %2135 }
0x27b2   :  { %1744 = vrot.lane.b32.xlu0 %v2136_v35, %s2176_s5 }
0x2824   :  { %v1745_v45 = vpop.permute.xlu0 %1744 }
0x2825   :  { %v1747_v36 = vmul.f32 %v1745_v45, %v1728_v41 }
0x2827   :  { %1749 = vrot.lane.b32.xlu1 %v1747_v36, %s2177_s6 }
0x2899   :  { %v1750_v22 = vpop.permute.xlu1 %1749 }
0x289a   :  { %1932 = vst.msk [vmem:[%s2675_s4 + $0x30] sm:$0xff] %vm70_vm0, %v1750_v22  ;;  %1933 = vmatmul.msk.f32.vlgmr.msrb.gmra.mxu0 %vm70_vm0, %v1750_v22 }
0x2917   :  { %v1773_v47 = vpop.f32.mrf.mxu0 }
0x2918   :  { %v1776_v48 = vadd.f32 %v1773_v47, %v1306_v46 }
0x291a   :  { %2137 = vtanh.f32 %v1776_v48  ;;  %v1934_v50 = vmul.f32 -1.442695, %v1776_v48 }
0x291c   :  { %2139 = vpow2.f32 %v1934_v50 }
0x2920   :  { %v2138_v49 = vpop.eup %2137 }
0x2921   :  { %1799 = vrot.lane.b32.xlu2 %v2138_v49, %s2176_s5 }
0x2922   :  { %v2140_v52 = vpop.eup %2139 }
0x2923   :  { %v1780_v53 = vadd.f32 1.0, %v2140_v52 }
0x2925   :  { %2141 = vrcp.f32 %v1780_v53  ;;  %v1792_v15 = vand.u32 2147483648, %v1780_v53  ;;  %vm1786_vm4 = vweird.f32 %v1780_v53  ;;  %v1790_v51 = vand.u32 2147483647, %v1780_v53 }
0x2927   :  { %v1793_v58 = vor.u32 1.1754944e-38, %v1792_v15  ;;  %vm1791_vm6 = vcmp.eq.f32.partialorder %v1790_v51, 8.507059e+37 }
0x292b   :  { %v2142_v54 = vpop.eup %2141 }
0x292c   :  { %v1782_v55 = vmul.f32 %v2142_v54, %v1780_v53  ;;  %vm1787_vm3 = vweird.f32 %v2142_v54 }
0x292d   :  { %vm1788_vm5 = vmor %vm1786_vm4, %vm1787_vm3 }
0x292e   :  { %v1783_v56 = vsub.f32 1.0, %v1782_v55 }
0x2930   :  { %v1784_v33 = vmul.f32 %v2142_v54, %v1783_v56 }
0x2932   :  { %v1785_v57 = vadd.f32 %v2142_v54, %v1784_v33 }
0x2934   :  { %v1789_v16 = vsel %vm1788_vm5, %v2142_v54, %v1785_v57 }
0x2935   :  { %v1794_v20 = vsel %vm1791_vm6, %v1793_v58, %v1789_v16 }
0x2936   :  { %v1797_v21 = vmul.f32 %v1794_v20, %v1741_v28 }
0x297b   :  { %v1800_v26 = vpop.permute.xlu2 %1799 }
0x297c   :  { %v1802_v59 = vmul.f32 %v1800_v26, %v1794_v20 }
0x297e   :  { %1804 = vrot.lane.b32.xlu0 %v1802_v59, %s2177_s6 }
0x29f0   :  { %v1805_v60 = vpop.permute.xlu0 %1804 }
0x29f1   :  { %v1807_v61 = vadd.f32 %v1805_v60, %v1797_v21 }
0x29f3   :  { %2143 = vtanh.f32 %v1807_v61 }
0x29f9   :  { %v2144_v62 = vpop.eup %2143 }
0x29fa   :  { %1810 = vrot.lane.b32.xlu1 %v2144_v62, %s2176_s5 }
0x2a6c   :  { %v1811_v63 = vpop.permute.xlu1 %1810 }
0x2a6d   :  { %v1813_v0 = vmul.f32 %v1811_v63, %v1794_v20 }
0x2a6f   :  { %1815 = vrot.lane.b32.xlu2 %v1813_v0, %s2177_s6 }
0x2ac9   :  { %v1816_v1 = vpop.permute.xlu2 %1815 }
0x2aca   :  { %1935 = vst.msk [vmem:[%s2675_s4 + $0x38] sm:$0xff] %vm70_vm0, %v1816_v1 }
0x2acb   :  { %1823 = vsyncpa [#allocation4], 1 }

</bundles_post_ra>
